<compile_context>
chip_gen: v7x
topology: tpu7x:2x2x1
jax: 0.10.0
libtpu: 0.0.40
codegen_flags: <defaults>
</compile_context>

<pallas_src>
import functools

import jax
import jax.numpy as jnp
from jax.experimental import pallas as pl
from jax.experimental.pallas import tpu as pltpu


def _round_up(v, m):
    return ((v + m - 1) // m) * m


def _mlp_kernel(x_ref, w1_ref, b1_ref, w2_ref, b2_ref, w3_ref, b3_ref, o_ref):
    # Whole fused forward for one batch tile. Matmuls accumulate in f32 on the
    # MXU; bias add + ReLU run in f32 on the VPU (v5e VALU has no bf16).
    cdt = w1_ref.dtype  # compute dtype of the MXU operands (f32 or bf16)
    x = x_ref[...]
    h = jnp.dot(x, w1_ref[...], preferred_element_type=jnp.float32) + b1_ref[...]
    h = jnp.maximum(h, 0.0).astype(cdt)
    h = jnp.dot(h, w2_ref[...], preferred_element_type=jnp.float32) + b2_ref[...]
    h = jnp.maximum(h, 0.0).astype(cdt)
    y = jnp.dot(h, w3_ref[...], preferred_element_type=jnp.float32) + b3_ref[...]
    o_ref[...] = y.astype(o_ref.dtype)


def pack_lcgp_params(w1, b1, w2, b2, w3, b3, *, pack=8, compute_dtype=jnp.float32):
    """Pre-pack parameters into lane-dense block-diagonal form (done once).

    Weights arrive in (in, out) layout (i.e. PyTorch nn.Linear weight already
    transposed).  Returns block-diagonal weights kron(I_pack, W) in
    `compute_dtype` and lane-tiled biases in f32.
    """
    def bd(w):
        return jnp.kron(jnp.eye(pack, dtype=w.dtype), w).astype(compute_dtype)

    def tile_bias(b):
        return jnp.tile(b.reshape(1, -1), (1, pack)).astype(jnp.float32)

    return (bd(w1), tile_bias(b1), bd(w2), tile_bias(b2), bd(w3), tile_bias(b3))


@functools.partial(jax.jit, static_argnames=("block_m", "pack"))
def lcgp_mlp_forward(x, w1p, b1p, w2p, b2p, w3p, b3p, *, block_m=512, pack=8):
    """x: (N, d_in). w*p/b*p: outputs of pack_lcgp_params (block-diag / tiled)."""
    N, d_in = x.shape
    h1 = w1p.shape[1] // pack
    h2 = w2p.shape[1] // pack
    d_out = w3p.shape[1] // pack
    compute_dtype = w1p.dtype

    # Keep kernel-visible row counts a multiple of 8 sublanes and clamp the
    # tile to the (padded) problem size; pad ragged batches with zero rows.
    block_m = max(pack * 8, min(block_m, _round_up(N, pack * 8)))
    block_m = _round_up(block_m, pack * 8)
    n_pad = _round_up(N, block_m)
    if n_pad != N:
        x = jnp.pad(x, ((0, n_pad - N), (0, 0)))

    # Free, bit-identical relayout in HBM: fold `pack` consecutive batch rows
    # into one lane-dense row of width pack*d_in.
    xp = x.reshape(n_pad // pack, pack * d_in).astype(compute_dtype)

    block_rows = block_m // pack
    grid = (n_pad // block_m,)

    flops = 2 * n_pad * (d_in * h1 + h1 * h2 + h2 * d_out)
    bytes_accessed = (
        xp.size * xp.dtype.itemsize
        + sum(a.size * a.dtype.itemsize for a in (w1p, b1p, w2p, b2p, w3p, b3p))
        + (n_pad // pack) * (pack * d_out) * 4
    )

    out = pl.pallas_call(
        _mlp_kernel,
        out_shape=jax.ShapeDtypeStruct((n_pad // pack, pack * d_out), jnp.float32),
        grid_spec=pltpu.PrefetchScalarGridSpec(
            num_scalar_prefetch=0,
            grid=grid,
            in_specs=[
                # Batch tile: lane-dense (block_rows, pack*d_in).
                pl.BlockSpec((block_rows, pack * d_in), lambda i: (i, 0)),
                # Weights / biases: constant block index -> DMA'd once and
                # kept resident in VMEM across all batch tiles (< 2 MiB).
                pl.BlockSpec(w1p.shape, lambda i: (0, 0)),
                pl.BlockSpec(b1p.shape, lambda i: (0, 0)),
                pl.BlockSpec(w2p.shape, lambda i: (0, 0)),
                pl.BlockSpec(b2p.shape, lambda i: (0, 0)),
                pl.BlockSpec(w3p.shape, lambda i: (0, 0)),
                pl.BlockSpec(b3p.shape, lambda i: (0, 0)),
            ],
            # Lane-dense output slab: last dim = pack*d_out (=128 for d_out=16),
            # so stores are unmasked vst; wrapper reshape back is free.
            out_specs=pl.BlockSpec((block_rows, pack * d_out), lambda i: (i, 0)),
        ),
        compiler_params=pltpu.CompilerParams(
            # Batch axis is independent -> shards across v7x's two TensorCores.
            dimension_semantics=("parallel",),
        ),
        cost_estimate=pl.CostEstimate(
            flops=flops, transcendentals=0, bytes_accessed=bytes_accessed
        ),
    )(xp, w1p, b1p, w2p, b2p, w3p, b3p)

    # Free reshape back to (N, d_out); drop padded rows.
    return out.reshape(n_pad, d_out)[:N]


def init_linear_params(key, fan_in, fan_out):
    """Deterministic init mimicking torch.nn.Linear (uniform ±1/sqrt(fan_in)).

    Returns weight already transposed to (fan_in, fan_out) and bias (fan_out,).
    """
    kw, kb = jax.random.split(key)
    bound = 1.0 / jnp.sqrt(jnp.float32(fan_in))
    w = jax.random.uniform(kw, (fan_in, fan_out), jnp.float32, -bound, bound)
    b = jax.random.uniform(kb, (1, fan_out), jnp.float32, -bound, bound)
    return w, b


if __name__ == "__main__":
    # Module config: lcgp_mlp(d_in=32, output_sizes=[64, 64, 16])
    d_in = 32
    output_sizes = [64, 64, 16]
    batch = 200      # non-multiple of the tile -> exercises the padding path
    block_m = 128    # >=2 grid steps: pipelining + megacore sharding on v7x

    key = jax.random.PRNGKey(0)
    kx, k1, k2, k3 = jax.random.split(key, 4)

    x = jax.random.normal(kx, (batch, d_in), jnp.float32)
    w1, b1 = init_linear_params(k1, d_in, output_sizes[0])
    w2, b2 = init_linear_params(k2, output_sizes[0], output_sizes[1])
    w3, b3 = init_linear_params(k3, output_sizes[1], output_sizes[2])

    # Pure-JAX reference (same semantics as the PyTorch forward).
    ref = jnp.maximum(x @ w1 + b1, 0.0)
    ref = jnp.maximum(ref @ w2 + b2, 0.0)
    ref = ref @ w3 + b3

    # f32 compute path (default): tight match to the reference.
    packed_f32 = pack_lcgp_params(w1, b1, w2, b2, w3, b3,
                                  pack=8, compute_dtype=jnp.float32)
    y = lcgp_mlp_forward(x, *packed_f32, block_m=block_m, pack=8)
    y = jax.block_until_ready(y)
    assert y.shape == (batch, output_sizes[-1])
    assert jnp.allclose(y, ref, atol=1e-4, rtol=1e-4)

    # bf16 compute path (v6e/v7x MXU lever): bf16 operands, f32 accumulation
    # and f32 bias/ReLU -> looser tolerance against the f32 reference.
    packed_bf16 = pack_lcgp_params(w1, b1, w2, b2, w3, b3,
                                   pack=8, compute_dtype=jnp.bfloat16)
    y_bf16 = lcgp_mlp_forward(x, *packed_bf16, block_m=block_m, pack=8)
    y_bf16 = jax.block_until_ready(y_bf16)
    assert y_bf16.shape == (batch, output_sizes[-1])
    assert bool(jnp.all(jnp.isfinite(y_bf16)))
    assert jnp.allclose(y_bf16, ref, atol=1e-1, rtol=1e-1)

    print("KERNEL_OK")
</pallas_src>

<mosaic_0001>
module attributes {stable_mosaic.version = 11 : i64} {
  func.func @_mlp_kernel(%arg0: i32, %arg1: memref<16x256xf32, #tpu.memory_space<vmem>>, %arg2: memref<256x512xf32, #tpu.memory_space<vmem>>, %arg3: memref<1x512xf32, #tpu.memory_space<vmem>>, %arg4: memref<512x512xf32, #tpu.memory_space<vmem>>, %arg5: memref<1x512xf32, #tpu.memory_space<vmem>>, %arg6: memref<512x128xf32, #tpu.memory_space<vmem>>, %arg7: memref<1x128xf32, #tpu.memory_space<vmem>>, %arg8: memref<16x128xf32, #tpu.memory_space<vmem>>) attributes {dimension_semantics = [#tpu.dimension_semantics<parallel>], iteration_bounds = array<i64: 2>, scalar_prefetch = 0 : i64, scratch_operands = 0 : i64, tpu.core_type = #tpu.core_type<tc>, window_params = [{transform_indices = @transform_0, window_bounds = array<i64: 16, 256>}, {pipeline_mode = #tpu.pipeline_mode<synchronous>, transform_indices = @transform_1, window_bounds = array<i64: 256, 512>}, {pipeline_mode = #tpu.pipeline_mode<synchronous>, transform_indices = @transform_2, window_bounds = array<i64: 1, 512>}, {pipeline_mode = #tpu.pipeline_mode<synchronous>, transform_indices = @transform_3, window_bounds = array<i64: 512, 512>}, {pipeline_mode = #tpu.pipeline_mode<synchronous>, transform_indices = @transform_4, window_bounds = array<i64: 1, 512>}, {pipeline_mode = #tpu.pipeline_mode<synchronous>, transform_indices = @transform_5, window_bounds = array<i64: 512, 128>}, {pipeline_mode = #tpu.pipeline_mode<synchronous>, transform_indices = @transform_6, window_bounds = array<i64: 1, 128>}, {transform_indices = @transform_7, window_bounds = array<i64: 16, 128>}]} {
    %c0 = arith.constant 0 : index
    %c0_0 = arith.constant 0 : index
    %0 = vector.load %arg1[%c0, %c0_0] : memref<16x256xf32, #tpu.memory_space<vmem>>, vector<16x256xf32>
    %c0_1 = arith.constant 0 : index
    %c0_2 = arith.constant 0 : index
    %1 = vector.load %arg2[%c0_1, %c0_2] : memref<256x512xf32, #tpu.memory_space<vmem>>, vector<256x512xf32>
    %cst = arith.constant dense<0.000000e+00> : vector<16x512xf32>
    %2 = tpu.matmul %0, %1, %cst {dimension_numbers = #tpu.dot_dimension_numbers<[1], [0], [0], [1], [0, 0, 1, 1], [], []>} : vector<16x256xf32>, vector<256x512xf32>, vector<16x512xf32> -> vector<16x512xf32>
    %c0_3 = arith.constant 0 : index
    %c0_4 = arith.constant 0 : index
    %3 = vector.load %arg3[%c0_3, %c0_4] : memref<1x512xf32, #tpu.memory_space<vmem>>, vector<1x512xf32>
    %4 = vector.broadcast %3 : vector<1x512xf32> to vector<16x512xf32>
    %5 = arith.addf %2, %4 : vector<16x512xf32>
    %cst_5 = arith.constant 0.000000e+00 : f32
    %6 = vector.broadcast %cst_5 : f32 to vector<16x512xf32>
    %7 = arith.maximumf %5, %6 : vector<16x512xf32>
    %c0_6 = arith.constant 0 : index
    %c0_7 = arith.constant 0 : index
    %8 = vector.load %arg4[%c0_6, %c0_7] : memref<512x512xf32, #tpu.memory_space<vmem>>, vector<512x512xf32>
    %cst_8 = arith.constant dense<0.000000e+00> : vector<16x512xf32>
    %9 = tpu.matmul %7, %8, %cst_8 {dimension_numbers = #tpu.dot_dimension_numbers<[1], [0], [0], [1], [0, 0, 1, 1], [], []>} : vector<16x512xf32>, vector<512x512xf32>, vector<16x512xf32> -> vector<16x512xf32>
    %c0_9 = arith.constant 0 : index
    %c0_10 = arith.constant 0 : index
    %10 = vector.load %arg5[%c0_9, %c0_10] : memref<1x512xf32, #tpu.memory_space<vmem>>, vector<1x512xf32>
    %11 = vector.broadcast %10 : vector<1x512xf32> to vector<16x512xf32>
    %12 = arith.addf %9, %11 : vector<16x512xf32>
    %cst_11 = arith.constant 0.000000e+00 : f32
    %13 = vector.broadcast %cst_11 : f32 to vector<16x512xf32>
    %14 = arith.maximumf %12, %13 : vector<16x512xf32>
    %c0_12 = arith.constant 0 : index
    %c0_13 = arith.constant 0 : index
    %15 = vector.load %arg6[%c0_12, %c0_13] : memref<512x128xf32, #tpu.memory_space<vmem>>, vector<512x128xf32>
    %cst_14 = arith.constant dense<0.000000e+00> : vector<16x128xf32>
    %16 = tpu.matmul %14, %15, %cst_14 {dimension_numbers = #tpu.dot_dimension_numbers<[1], [0], [0], [1], [0, 0, 1, 1], [], []>} : vector<16x512xf32>, vector<512x128xf32>, vector<16x128xf32> -> vector<16x128xf32>
    %c0_15 = arith.constant 0 : index
    %c0_16 = arith.constant 0 : index
    %17 = vector.load %arg7[%c0_15, %c0_16] : memref<1x128xf32, #tpu.memory_space<vmem>>, vector<1x128xf32>
    %18 = vector.broadcast %17 : vector<1x128xf32> to vector<16x128xf32>
    %19 = arith.addf %16, %18 : vector<16x128xf32>
    %c0_17 = arith.constant 0 : index
    %c0_18 = arith.constant 0 : index
    %20 = vector.load %arg8[%c0_17, %c0_18] : memref<16x128xf32, #tpu.memory_space<vmem>>, vector<16x128xf32>
    tpu.vector_store %arg8[%c0_17, %c0_18], %19 {strides = array<i32>} : memref<16x128xf32, #tpu.memory_space<vmem>>, vector<16x128xf32>,
    return
  }
  func.func @transform_0(%arg0: i32) -> (i32, i32) {
    %c0_i32 = arith.constant 0 : i32
    %c0_i32_0 = arith.constant 0 : i32
    return %arg0, %c0_i32 : i32, i32
  }
  func.func @transform_1(%arg0: i32) -> (i32, i32) {
    %c0_i32 = arith.constant 0 : i32
    %c0_i32_0 = arith.constant 0 : i32
    %c0_i32_1 = arith.constant 0 : i32
    return %c0_i32, %c0_i32_0 : i32, i32
  }
  func.func @transform_2(%arg0: i32) -> (i32, i32) {
    %c0_i32 = arith.constant 0 : i32
    %c0_i32_0 = arith.constant 0 : i32
    %c0_i32_1 = arith.constant 0 : i32
    return %c0_i32, %c0_i32_0 : i32, i32
  }
  func.func @transform_3(%arg0: i32) -> (i32, i32) {
    %c0_i32 = arith.constant 0 : i32
    %c0_i32_0 = arith.constant 0 : i32
    %c0_i32_1 = arith.constant 0 : i32
    return %c0_i32, %c0_i32_0 : i32, i32
  }
  func.func @transform_4(%arg0: i32) -> (i32, i32) {
    %c0_i32 = arith.constant 0 : i32
    %c0_i32_0 = arith.constant 0 : i32
    %c0_i32_1 = arith.constant 0 : i32
    return %c0_i32, %c0_i32_0 : i32, i32
  }
  func.func @transform_5(%arg0: i32) -> (i32, i32) {
    %c0_i32 = arith.constant 0 : i32
    %c0_i32_0 = arith.constant 0 : i32
    %c0_i32_1 = arith.constant 0 : i32
    return %c0_i32, %c0_i32_0 : i32, i32
  }
  func.func @transform_6(%arg0: i32) -> (i32, i32) {
    %c0_i32 = arith.constant 0 : i32
    %c0_i32_0 = arith.constant 0 : i32
    %c0_i32_1 = arith.constant 0 : i32
    return %c0_i32, %c0_i32_0 : i32, i32
  }
  func.func @transform_7(%arg0: i32) -> (i32, i32) {
    %c0_i32 = arith.constant 0 : i32
    %c0_i32_0 = arith.constant 0 : i32
    return %arg0, %c0_i32 : i32, i32
  }
}

</mosaic_0001>

<bundles_post_ra>
// kernel: lcgp_mlp_forward.1
= control target key start
LH: loop header
LB: loop body
LE: loop exit
PB: predicated region body
PF: predicated region fallthrough
CT: control target
= control target key end

     0   :  { %12 = vsyncpa [#allocation3], 0  ;;  %s2787_s0 = inlined_call_operand.vmem [shape: f32[32,256], index: 0, kind: input, shape index: {}]   ;;  %s2788_s1 = inlined_call_operand.vmem [shape: f32[256,512], index: 1, kind: input, shape index: {}]   ;;  %s2789_s2 = inlined_call_operand.vmem [shape: f32[1,512], index: 2, kind: input, shape index: {}]   ;;  %s2790_s3 = inlined_call_operand.hbm [shape: f32[512,512], index: 3, kind: input, shape index: {}]   ;;  %s2791_s4 = inlined_call_operand.vmem [shape: f32[1,512], index: 4, kind: input, shape index: {}]   ;;  %s2792_s5 = inlined_call_operand.hbm [shape: f32[512,128], index: 5, kind: input, shape index: {}]   ;;  %s2793_s6 = inlined_call_operand.vmem [shape: f32[1,128], index: 6, kind: input, shape index: {}]   ;;  %s2794_s7 = inlined_call_operand.vmem [shape: f32[32,128], index: 7, kind: output, shape index: {}]  }
   0x1   :  { %13 = vsyncpa [#allocation5], 0  ;;  %s2235_s24 = smov 0  }
   0x2 LB: > { %s2189_s25 = smov [#allocation2]   ;;  %s1526_s27 = sadd.s32 4294967295, %s2187_s24   ;;  %s2187_s24 = sphi %s2235_s24, %s19_s24  }
   0x3   : > { %s220_s26 = sshll.u32 %s2189_s25, 4  ;;  %p1528_p0 = scmp.ge.s32.totalorder %s2187_s24, 1  ;;  %s221_s26 = int_to_ptr.vmem [resolvable:$true] %s220_s26 }
   0x4   : > { %p202_p1 = scmp.lt.s32.totalorder %s2187_s24, 3  ;;  %p2249_p3 = scmp.eq.s32.totalorder %s1526_s27, 0 }
   0x5   : > { %s2190_s30 = smov [#allocation4]   ;;  %s2117_s12 = scalar_lea.hbm %s2790_s3, 32768 }
   0x6   : > { %p2243_p2 = pnand %p1528_p0, %p202_p1  ;;  %s236_s8 = sshll.u32 %s2190_s30, 4  ;;  %s2261_s8 = int_to_ptr.vmem [resolvable:$true] %s236_s8 }
   0x7   : > { %s2799_s29 = scalar_select %p2249_p3, 1, 0 }
   0x8   : > { %s2798_s28 = scalar_select %p2243_p2, 1, 0 }
   0x9   : > { %p2092_p4 = pneg %p2243_p2  ;;  %p2118_p6 = scmp.ne.s32.totalorder %s2790_s3, %s2117_s12 }
   0xa   : > { %p2124_p10 = scmp.lt.u32.totalorder %s2117_s12, %s2790_s3 }
   0xb   : > { %p2257_p5 = pnand %p2249_p3, %p2092_p4 }
   0xd   : > { %p2119_p7 = pneg %p2257_p5 }
   0xf   : > { %p2120_p8 = pnand %p2119_p7, %p2118_p6 }
  0x11   : > { %p2121_p9 = pneg %p2120_p8 }
  0x13   : > { %p2126_p11 = pnand %p2124_p10, %p2121_p9 }
  0x15   : > { %2129 = shalt.err (!%p2126_p11)
}
  0x16   : > { %s2130_s17 = scalar_lea.vmem %s221_s26, 32768  ;;  %p2138_p1 = scmp.lt.s32.totalorder %s221_s26, %s221_s26 }
  0x17   : > { %p2131_p12 = scmp.ne.s32.totalorder %s221_s26, %s2130_s17  ;;  %p2139_p4 = scmp.lt.s32.totalorder %s2130_s17, %s2130_s17 }
  0x19   : > { %p2133_p13 = pnand %p2131_p12, %p2119_p7  ;;  %p2140_p3 = por %p2139_p4, %p2138_p1 }
  0x1b   : > { %p2134_p0 = pneg %p2133_p13 }
  0x1d   : > { %p2141_p2 = pnand %p2140_p3, %p2134_p0 }
  0x1f   : > { %2144 = shalt.err (!%p2141_p2)
}
  0x20   : > { %s2191_s18 = smov 512   ;;  %s2192_s19 = smov 32  }
  0x21   : > { %2095 = dma.hbm_to_vmem [thread:$0]  (!%p2257_p5), %s2790_s3, 32768, %s221_s26, [#allocation3], %s2191_s18, %s2191_s18, %s2192_s19  }
  0x22   : > { %s2145_s25 = scalar_lea.hbm %s2792_s5, 8192 }
  0x23   : > { %p2146_p6 = scmp.ne.s32.totalorder %s2792_s5, %s2145_s25  ;;  %p2152_p8 = scmp.lt.u32.totalorder %s2145_s25, %s2792_s5 }
  0x25   : > { %p2148_p2 = pnand %p2146_p6, %p2119_p7 }
  0x27   : > { %p2149_p3 = pneg %p2148_p2 }
  0x29   : > { %p2154_p9 = pnand %p2152_p8, %p2149_p3 }
  0x2b   : > { %2157 = shalt.err (!%p2154_p9)
}
  0x2c   : > { %s2158_s26 = scalar_lea.vmem %s2261_s8, 8192  ;;  %p2166_p13 = scmp.lt.s32.totalorder %s2261_s8, %s2261_s8 }
  0x2d   : > { %p2159_p10 = scmp.ne.s32.totalorder %s2261_s8, %s2158_s26  ;;  %p2167_p0 = scmp.lt.s32.totalorder %s2158_s26, %s2158_s26 }
  0x2f   : > { %p2161_p11 = pnand %p2159_p10, %p2119_p7  ;;  %p2168_p1 = por %p2167_p0, %p2166_p13 }
  0x31   : > { %p2162_p12 = pneg %p2161_p11 }
  0x33   : > { %p2169_p4 = pnand %p2168_p1, %p2162_p12 }
  0x35   : > { %2172 = shalt.err (!%p2169_p4)
}
  0x36   : > { %s2193_s13 = smov 128   ;;  %s2194_s14 = smov 8  }
  0x37   : > { %2098 = dma.hbm_to_vmem [thread:$0]  (!%p2257_p5), %s2792_s5, 8192, %s2261_s8, [#allocation5], %s2193_s13, %s2193_s13, %s2194_s14  }
  0x38   : > { %p2801_p6 = scmp.ne.s32.totalorder %s2798_s28, 0 }
  0x39   : > { %p2802_p7 = scmp.ne.s32.totalorder (!%p2801_p6), %s2799_s29, 0 }
  0x3a   : > { %265 = sbr.rel (%p2801_p6) target bundleno = 860 (0x35c), region = 48 }
  0x41   : > { %2178 = dma.done.wait (%p2802_p7), [#allocation3], 32768  }
  0x42   : > { %2180 = vsyncadd (%p2802_p7), [#allocation3], 4294934528 }
  0x43   : > { %2182 = dma.done.wait (%p2802_p7), [#allocation5], 8192  }
  0x44   : > { %2184 = vsyncadd (%p2802_p7), [#allocation5], 4294959104  ;;  %v320_v0 = vld [vmem:[%s2788_s1 + $0x8] sm:$0xff]  ;;  %v319_v2 = vld [vmem:[%s2788_s1] sm:$0xff]  ;;  %s1535_s18 = sshll.u32 %s1526_s27, 1 }
  0x45   : > { %v324_v1 = vld [vmem:[%s2788_s1 + $0x28] sm:$0xff]  ;;  %v323_v4 = vld [vmem:[%s2788_s1 + $0x20] sm:$0xff]  ;;  %p303_p5 = scmp.lt.s32.totalorder %s1535_s18, 3  ;;  %v322_v43 = vld [vmem:[%s2788_s1 + $0x18] sm:$0xff] }
  0x46   : > { %v1620_v3 = vpack.c.bf16 %v324_v1, %v320_v0  ;;  %v328_v5 = vld [vmem:[%s2788_s1 + $0x48] sm:$0xff]  ;;  %v1622_v7 = vpack.c.bf16 %v323_v4, %v319_v2  ;;  %v327_v9 = vld [vmem:[%s2788_s1 + $0x40] sm:$0xff]  ;;  %v326_v44 = vld [vmem:[%s2788_s1 + $0x38] sm:$0xff] }
  0x47   : > { %v332_v6 = vld [vmem:[%s2788_s1 + $0x68] sm:$0xff]  ;;  %v331_v10 = vld [vmem:[%s2788_s1 + $0x60] sm:$0xff]  ;;  %s2804_s18 = smov (!%p303_p5, %s1535_s18), 3  ;;  %v1684_v45 = vpack.c.bf16 %v326_v44, %v322_v43  ;;  %v321_v47 = vld [vmem:[%s2788_s1 + $0x10] sm:$0xff] }
  0x48   : > { %v1624_v8 = vpack.c.bf16 %v332_v6, %v328_v5  ;;  %v336_v11 = vld [vmem:[%s2788_s1 + $0x88] sm:$0xff]  ;;  %1621 = vmatprep.subr.bf16.mxu0 %v1620_v3  ;;  %v1626_v13 = vpack.c.bf16 %v331_v10, %v327_v9  ;;  %v335_v15 = vld [vmem:[%s2788_s1 + $0x80] sm:$0xff]  ;;  %s1543_s8 = sshll.u32 %s2804_s18, 4  ;;  %v325_v48 = vld [vmem:[%s2788_s1 + $0x30] sm:$0xff]  ;;  %s1539_s17 = sshll.u32 %s2804_s18, 3 }
  0x49   : > { %v340_v12 = vld [vmem:[%s2788_s1 + $0xa8] sm:$0xff]  ;;  %1623 = vmatpush1.bf16.msra.mxu0 %v1622_v7  ;;  %v339_v16 = vld [vmem:[%s2788_s1 + $0xa0] sm:$0xff]  ;;  %s2406_s10 = scalar_lea.vmem %s2787_s0, %s1543_s8  ;;  %v1686_v50 = vpack.c.bf16 %v325_v48, %v321_v47  ;;  %v330_v51 = vld [vmem:[%s2788_s1 + $0x58] sm:$0xff]  ;;  %1685 = vmatprep.subr.bf16.mxu1 %v1684_v45  ;;  %s313_s19 = scalar_lea.vmem %s2794_s7, %s1539_s17 }
  0x4a   : > { %1625 = vmatprep.subr.bf16.mxu0 %v1624_v8  ;;  %v1628_v14 = vpack.c.bf16 %v340_v12, %v336_v11  ;;  %v344_v17 = vld [vmem:[%s2788_s1 + $0xc8] sm:$0xff]  ;;  %v1630_v19 = vpack.c.bf16 %v339_v16, %v335_v15  ;;  %v343_v21 = vld [vmem:[%s2788_s1 + $0xc0] sm:$0xff]  ;;  %v334_v52 = vld [vmem:[%s2788_s1 + $0x78] sm:$0xff] }
  0x4b   : > { %v348_v18 = vld [vmem:[%s2788_s1 + $0xe8] sm:$0xff]  ;;  %v347_v22 = vld [vmem:[%s2788_s1 + $0xe0] sm:$0xff]  ;;  %v1688_v54 = vpack.c.bf16 %v334_v52, %v330_v51  ;;  %v329_v55 = vld [vmem:[%s2788_s1 + $0x50] sm:$0xff]  ;;  %1687 = vmatpush1.bf16.msra.mxu1 %v1686_v50 }
  0x4c   : > { %v1632_v20 = vpack.c.bf16 %v348_v18, %v344_v17  ;;  %v352_v23 = vld [vmem:[%s2788_s1 + $0x108] sm:$0xff]  ;;  %v1634_v25 = vpack.c.bf16 %v347_v22, %v343_v21  ;;  %v351_v27 = vld [vmem:[%s2788_s1 + $0x100] sm:$0xff]  ;;  %v333_v56 = vld [vmem:[%s2788_s1 + $0x70] sm:$0xff] }
  0x4d   : > { %1627 = vmatpush1.bf16.msra.mxu0 %v1626_v13  ;;  %v356_v24 = vld [vmem:[%s2788_s1 + $0x128] sm:$0xff]  ;;  %v355_v28 = vld [vmem:[%s2788_s1 + $0x120] sm:$0xff]  ;;  %v338_v57 = vld [vmem:[%s2788_s1 + $0x98] sm:$0xff]  ;;  %v1690_v61 = vpack.c.bf16 %v333_v56, %v329_v55  ;;  %1689 = vmatprep.subr.bf16.mxu1 %v1688_v54 }
  0x4e   : > { %1629 = vmatprep.subr.bf16.mxu0 %v1628_v14  ;;  %v1636_v26 = vpack.c.bf16 %v356_v24, %v352_v23  ;;  %v360_v29 = vld [vmem:[%s2788_s1 + $0x148] sm:$0xff]  ;;  %v1638_v31 = vpack.c.bf16 %v355_v28, %v351_v27  ;;  %v359_v33 = vld [vmem:[%s2788_s1 + $0x140] sm:$0xff]  ;;  %v342_v62 = vld [vmem:[%s2788_s1 + $0xb8] sm:$0xff] }
  0x4f   : > { %v364_v30 = vld [vmem:[%s2788_s1 + $0x168] sm:$0xff]  ;;  %v363_v34 = vld [vmem:[%s2788_s1 + $0x160] sm:$0xff]  ;;  %v1692_v0 = vpack.c.bf16 %v342_v62, %v338_v57  ;;  %v337_v1 = vld [vmem:[%s2788_s1 + $0x90] sm:$0xff]  ;;  %1691 = vmatpush1.bf16.msra.mxu1 %v1690_v61 }
  0x50   : > { %v1640_v32 = vpack.c.bf16 %v364_v30, %v360_v29  ;;  %v368_v35 = vld [vmem:[%s2788_s1 + $0x188] sm:$0xff]  ;;  %v1642_v37 = vpack.c.bf16 %v363_v34, %v359_v33  ;;  %v367_v38 = vld [vmem:[%s2788_s1 + $0x180] sm:$0xff]  ;;  %v341_v2 = vld [vmem:[%s2788_s1 + $0xb0] sm:$0xff] }
  0x51   : > { %1631 = vmatpush1.bf16.msra.mxu0 %v1630_v19  ;;  %v372_v36 = vld [vmem:[%s2788_s1 + $0x1a8] sm:$0xff]  ;;  %v371_v39 = vld [vmem:[%s2788_s1 + $0x1a0] sm:$0xff]  ;;  %v346_v3 = vld [vmem:[%s2788_s1 + $0xd8] sm:$0xff]  ;;  %v1694_v10 = vpack.c.bf16 %v341_v2, %v337_v1  ;;  %1693 = vmatprep.subr.bf16.mxu1 %v1692_v0 }
  0x52   : > { %1633 = vmatprep.subr.bf16.mxu0 %v1632_v20  ;;  %v376_v40 = vld [vmem:[%s2788_s1 + $0x1c8] sm:$0xff]  ;;  %v1644_v41 = vpack.c.bf16 %v372_v36, %v368_v35  ;;  %v375_v49 = vld [vmem:[%s2788_s1 + $0x1c0] sm:$0xff]  ;;  %v1646_v53 = vpack.c.bf16 %v371_v39, %v367_v38  ;;  %v350_v4 = vld [vmem:[%s2788_s1 + $0xf8] sm:$0xff] }
  0x53   : > { %v380_v42 = vld [vmem:[%s2788_s1 + $0x1e8] sm:$0xff]  ;;  %v379_v59 = vld [vmem:[%s2788_s1 + $0x1e0] sm:$0xff]  ;;  %v1696_v12 = vpack.c.bf16 %v350_v4, %v346_v3  ;;  %v345_v13 = vld [vmem:[%s2788_s1 + $0xd0] sm:$0xff]  ;;  %1695 = vmatpush1.bf16.msra.mxu1 %v1694_v10 }
  0x54   : > { %v316_v46 = vld [vmem:[%s2406_s10 + $0x8] sm:$0xff]  ;;  %v1648_v58 = vpack.c.bf16 %v380_v42, %v376_v40  ;;  %v1650_v5 = vpack.c.bf16 %v379_v59, %v375_v49  ;;  %v383_v7 = vld [vmem:[%s2788_s1 + $0x200] sm:$0xff]  ;;  %v349_v14 = vld [vmem:[%s2788_s1 + $0xf0] sm:$0xff] }
  0x55   : > { %1635 = vmatpush1.bf16.msra.mxu0 %v1634_v25  ;;  %533 = vmatprep.mubr.f32.mxu0 %v316_v46  ;;  %v384_v60 = vld [vmem:[%s2788_s1 + $0x208] sm:$0xff]  ;;  %v387_v8 = vld [vmem:[%s2788_s1 + $0x220] sm:$0xff]  ;;  %v354_v15 = vld [vmem:[%s2788_s1 + $0x118] sm:$0xff]  ;;  %v1698_v22 = vpack.c.bf16 %v349_v14, %v345_v13 }
  0x56   : > { %1637 = vmatprep.subr.bf16.mxu0 %v1636_v26  ;;  %610 = vmatprep.mubr.f32.mxu1 %v316_v46  ;;  %v388_v63 = vld [vmem:[%s2788_s1 + $0x228] sm:$0xff]  ;;  %v358_v16 = vld [vmem:[%s2788_s1 + $0x138] sm:$0xff]  ;;  %v1654_v17 = vpack.c.bf16 %v387_v8, %v383_v7  ;;  %v391_v19 = vld [vmem:[%s2788_s1 + $0x240] sm:$0xff] }
  0x57   : > { %v1652_v6 = vpack.c.bf16 %v388_v63, %v384_v60  ;;  %v392_v9 = vld [vmem:[%s2788_s1 + $0x248] sm:$0xff]  ;;  %v395_v20 = vld [vmem:[%s2788_s1 + $0x260] sm:$0xff]  ;;  %1697 = vmatprep.subr.bf16.mxu1 %v1696_v12  ;;  %v1700_v24 = vpack.c.bf16 %v358_v16, %v354_v15  ;;  %v353_v25 = vld [vmem:[%s2788_s1 + $0x110] sm:$0xff] }
  0x58   : > { %v396_v11 = vld [vmem:[%s2788_s1 + $0x268] sm:$0xff]  ;;  %v357_v26 = vld [vmem:[%s2788_s1 + $0x130] sm:$0xff]  ;;  %v362_v27 = vld [vmem:[%s2788_s1 + $0x158] sm:$0xff]  ;;  %v1658_v29 = vpack.c.bf16 %v395_v20, %v391_v19  ;;  %1699 = vmatpush1.bf16.msra.mxu1 %v1698_v22 }
  0x59   : > { %1639 = vmatpush1.bf16.msra.mxu0 %v1638_v31  ;;  %v1656_v18 = vpack.c.bf16 %v396_v11, %v392_v9  ;;  %v400_v21 = vld [vmem:[%s2788_s1 + $0x288] sm:$0xff]  ;;  %v366_v28 = vld [vmem:[%s2788_s1 + $0x178] sm:$0xff]  ;;  %v399_v31 = vld [vmem:[%s2788_s1 + $0x280] sm:$0xff]  ;;  %v1702_v34 = vpack.c.bf16 %v357_v26, %v353_v25  ;;  %1701 = vmatprep.subr.bf16.mxu1 %v1700_v24 }
  0x5a   : > { %1641 = vmatprep.subr.bf16.mxu0 %v1640_v32  ;;  %v404_v23 = vld [vmem:[%s2788_s1 + $0x2a8] sm:$0xff]  ;;  %v403_v32 = vld [vmem:[%s2788_s1 + $0x2a0] sm:$0xff]  ;;  %v1704_v36 = vpack.c.bf16 %v366_v28, %v362_v27  ;;  %v365_v38 = vld [vmem:[%s2788_s1 + $0x170] sm:$0xff] }
  0x5b   : > { %v1660_v30 = vpack.c.bf16 %v404_v23, %v400_v21  ;;  %v408_v33 = vld [vmem:[%s2788_s1 + $0x2c8] sm:$0xff]  ;;  %v370_v39 = vld [vmem:[%s2788_s1 + $0x198] sm:$0xff]  ;;  %v407_v43 = vld [vmem:[%s2788_s1 + $0x2c0] sm:$0xff] }
  0x5c   : > { %v412_v35 = vld [vmem:[%s2788_s1 + $0x2e8] sm:$0xff]  ;;  %v374_v40 = vld [vmem:[%s2788_s1 + $0x1b8] sm:$0xff]  ;;  %v411_v44 = vld [vmem:[%s2788_s1 + $0x2e0] sm:$0xff]  ;;  %1703 = vmatpush1.bf16.msra.mxu1 %v1702_v34 }
  0x5d   : > { %1643 = vmatpush1.bf16.msra.mxu0 %v1642_v37  ;;  %v361_v37 = vld [vmem:[%s2788_s1 + $0x150] sm:$0xff]  ;;  %v1664_v42 = vpack.c.bf16 %v412_v35, %v408_v33  ;;  %v416_v45 = vld [vmem:[%s2788_s1 + $0x308] sm:$0xff]  ;;  %1705 = vmatprep.subr.bf16.mxu1 %v1704_v36  ;;  %v1708_v48 = vpack.c.bf16 %v374_v40, %v370_v39  ;;  %v378_v51 = vld [vmem:[%s2788_s1 + $0x1d8] sm:$0xff] }
  0x5e   : > { %1645 = vmatprep.subr.bf16.mxu0 %v1644_v41  ;;  %v1662_v41 = vpack.c.bf16 %v403_v32, %v399_v31  ;;  %v1706_v46 = vpack.c.bf16 %v365_v38, %v361_v37  ;;  %v420_v47 = vld [vmem:[%s2788_s1 + $0x328] sm:$0xff]  ;;  %v369_v49 = vld [vmem:[%s2788_s1 + $0x190] sm:$0xff]  ;;  %v382_v52 = vld [vmem:[%s2788_s1 + $0x1f8] sm:$0xff] }
  0x5f   : > { %v373_v50 = vld [vmem:[%s2788_s1 + $0x1b0] sm:$0xff]  ;;  %v1668_v54 = vpack.c.bf16 %v420_v47, %v416_v45  ;;  %v415_v55 = vld [vmem:[%s2788_s1 + $0x300] sm:$0xff]  ;;  %v424_v57 = vld [vmem:[%s2788_s1 + $0x348] sm:$0xff]  ;;  %v1712_v60 = vpack.c.bf16 %v382_v52, %v378_v51 }
  0x60   : > { %v419_v56 = vld [vmem:[%s2788_s1 + $0x320] sm:$0xff]  ;;  %1707 = vmatpush1.bf16.msra.mxu1 %v1706_v46  ;;  %v428_v59 = vld [vmem:[%s2788_s1 + $0x368] sm:$0xff]  ;;  %v377_v61 = vld [vmem:[%s2788_s1 + $0x1d0] sm:$0xff] }
  0x61   : > { %1647 = vmatpush1.bf16.msra.mxu0 %v1646_v53  ;;  %v1666_v53 = vpack.c.bf16 %v411_v44, %v407_v43  ;;  %1709 = vmatprep.subr.bf16.mxu1 %v1708_v48  ;;  %v381_v62 = vld [vmem:[%s2788_s1 + $0x1f0] sm:$0xff]  ;;  %v386_v63 = vld [vmem:[%s2788_s1 + $0x218] sm:$0xff]  ;;  %v1670_v1 = vpack.c.bf16 %v419_v56, %v415_v55  ;;  %v1672_v2 = vpack.c.bf16 %v428_v59, %v424_v57  ;;  %v423_v3 = vld [vmem:[%s2788_s1 + $0x340] sm:$0xff] }
  0x62   : > { %1649 = vmatprep.subr.bf16.mxu0 %v1648_v58  ;;  %v1710_v58 = vpack.c.bf16 %v373_v50, %v369_v49  ;;  %v390_v0 = vld [vmem:[%s2788_s1 + $0x238] sm:$0xff]  ;;  %v427_v4 = vld [vmem:[%s2788_s1 + $0x360] sm:$0xff]  ;;  %v436_v7 = vld [vmem:[%s2788_s1 + $0x3a8] sm:$0xff] }
  0x63   : > { %v1716_v8 = vpack.c.bf16 %v390_v0, %v386_v63  ;;  %v385_v9 = vld [vmem:[%s2788_s1 + $0x210] sm:$0xff]  ;;  %v394_v11 = vld [vmem:[%s2788_s1 + $0x258] sm:$0xff]  ;;  %v1674_v13 = vpack.c.bf16 %v427_v4, %v423_v3  ;;  %v431_v15 = vld [vmem:[%s2788_s1 + $0x380] sm:$0xff] }
  0x64   : > { %1711 = vmatpush1.bf16.msra.mxu1 %v1710_v58  ;;  %v389_v10 = vld [vmem:[%s2788_s1 + $0x230] sm:$0xff]  ;;  %v398_v12 = vld [vmem:[%s2788_s1 + $0x278] sm:$0xff]  ;;  %v435_v16 = vld [vmem:[%s2788_s1 + $0x3a0] sm:$0xff] }
  0x65   : > { %1651 = vmatpush1.bf16.msra.mxu0 %v1650_v5  ;;  %v432_v5 = vld [vmem:[%s2788_s1 + $0x388] sm:$0xff]  ;;  %1713 = vmatprep.subr.bf16.mxu1 %v1712_v60  ;;  %v1720_v20 = vpack.c.bf16 %v398_v12, %v394_v11  ;;  %v393_v21 = vld [vmem:[%s2788_s1 + $0x250] sm:$0xff]  ;;  %v402_v23 = vld [vmem:[%s2788_s1 + $0x298] sm:$0xff]  ;;  %v1678_v25 = vpack.c.bf16 %v435_v16, %v431_v15 }
  0x66   : > { %1653 = vmatprep.subr.bf16.mxu0 %v1652_v6  ;;  %v1714_v6 = vpack.c.bf16 %v381_v62, %v377_v61  ;;  %v1676_v14 = vpack.c.bf16 %v436_v7, %v432_v5  ;;  %v444_v19 = vld [vmem:[%s2788_s1 + $0x3e8] sm:$0xff]  ;;  %v397_v22 = vld [vmem:[%s2788_s1 + $0x270] sm:$0xff]  ;;  %v406_v24 = vld [vmem:[%s2788_s1 + $0x2b8] sm:$0xff] }
  0x67   : > { %v439_v27 = vld [vmem:[%s2788_s1 + $0x3c0] sm:$0xff]  ;;  %v1724_v31 = vpack.c.bf16 %v406_v24, %v402_v23  ;;  %v405_v32 = vld [vmem:[%s2788_s1 + $0x2b0] sm:$0xff]  ;;  %v632_v33 = vld [vmem:[#allocation2 + $0x8] sm:$0xff] }
  0x68   : > { %1715 = vmatpush1.bf16.msra.mxu1 %v1714_v6  ;;  %v443_v28 = vld [vmem:[%s2788_s1 + $0x3e0] sm:$0xff]  ;;  %v636_v34 = vld [vmem:[#allocation2 + $0x28] sm:$0xff]  ;;  %v410_v35 = vld [vmem:[%s2788_s1 + $0x2d8] sm:$0xff] }
  0x69   : > { %1655 = vmatpush1.bf16.msra.mxu0 %v1654_v17  ;;  %v440_v17 = vld [vmem:[%s2788_s1 + $0x3c8] sm:$0xff]  ;;  %1717 = vmatprep.subr.bf16.mxu1 %v1716_v8  ;;  %v414_v36 = vld [vmem:[%s2788_s1 + $0x2f8] sm:$0xff]  ;;  %v1682_v37 = vpack.c.bf16 %v443_v28, %v439_v27  ;;  %v409_v39 = vld [vmem:[%s2788_s1 + $0x2d0] sm:$0xff]  ;;  %v1748_v40 = vpack.c.bf16 %v636_v34, %v632_v33 }
  0x6a   : > { %1657 = vmatprep.subr.bf16.mxu0 %v1656_v18  ;;  %v1718_v18 = vpack.c.bf16 %v389_v10, %v385_v9  ;;  %v1680_v26 = vpack.c.bf16 %v444_v19, %v440_v17  ;;  %v1728_v43 = vpack.c.bf16 %v414_v36, %v410_v35  ;;  %v413_v44 = vld [vmem:[%s2788_s1 + $0x2f0] sm:$0xff]  ;;  %v640_v45 = vld [vmem:[#allocation2 + $0x48] sm:$0xff]  ;;  %v418_v47 = vld [vmem:[%s2788_s1 + $0x318] sm:$0xff] }
  0x6b   : > { %v644_v46 = vld [vmem:[#allocation2 + $0x68] sm:$0xff]  ;;  %v422_v48 = vld [vmem:[%s2788_s1 + $0x338] sm:$0xff]  ;;  %v2674_v49 = vld [vmem:[%s2406_s10] sm:$0xff]  ;;  %v1730_v52 = vpack.c.bf16 %v413_v44, %v409_v39 }
  0x6c   : > { %1719 = vmatpush1.bf16.msra.mxu1 %v1718_v18  ;;  %v417_v50 = vld [vmem:[%s2788_s1 + $0x310] sm:$0xff]  ;;  %v639_v55 = vld [vmem:[#allocation2 + $0x40] sm:$0xff]  ;;  %v1732_v57 = vpack.c.bf16 %v422_v48, %v418_v47  ;;  %v648_v59 = vld [vmem:[#allocation2 + $0x88] sm:$0xff] }
  0x6d   : > { %1659 = vmatpush1.bf16.msra.mxu0 %v1658_v29  ;;  %v1722_v29 = vpack.c.bf16 %v397_v22, %v393_v21  ;;  %1721 = vmatprep.subr.bf16.mxu1 %v1720_v20  ;;  %v643_v56 = vld [vmem:[#allocation2 + $0x60] sm:$0xff]  ;;  %v421_v58 = vld [vmem:[%s2788_s1 + $0x330] sm:$0xff]  ;;  %v652_v60 = vld [vmem:[#allocation2 + $0xa8] sm:$0xff] }
  0x6e   : > { %1661 = vmatprep.subr.bf16.mxu0 %v1660_v30  ;;  %v401_v30 = vld [vmem:[%s2788_s1 + $0x290] sm:$0xff]  ;;  %v426_v61 = vld [vmem:[%s2788_s1 + $0x358] sm:$0xff]  ;;  %v1754_v0 = vpack.c.bf16 %v643_v56, %v639_v55  ;;  %v1756_v3 = vpack.c.bf16 %v652_v60, %v648_v59  ;;  %v647_v4 = vld [vmem:[#allocation2 + $0x80] sm:$0xff] }
  0x6f   : > { %v1726_v38 = vpack.c.bf16 %v405_v32, %v401_v30  ;;  %v430_v62 = vld [vmem:[%s2788_s1 + $0x378] sm:$0xff]  ;;  %v2694_v63 = vld [vmem:[%s2406_s10 + $0x10] sm:$0xff]  ;;  %v651_v5 = vld [vmem:[#allocation2 + $0xa0] sm:$0xff] }
  0x70   : > { %1723 = vmatpush1.bf16.msra.mxu1 %v1722_v29  ;;  %v1736_v6 = vpack.c.bf16 %v430_v62, %v426_v61  ;;  %v429_v7 = vld [vmem:[%s2788_s1 + $0x370] sm:$0xff]  ;;  %v656_v8 = vld [vmem:[#allocation2 + $0xc8] sm:$0xff]  ;;  %v434_v10 = vld [vmem:[%s2788_s1 + $0x398] sm:$0xff]  ;;  %v1758_v12 = vpack.c.bf16 %v651_v5, %v647_v4 }
  0x71   : > { %1663 = vmatpush1.bf16.msra.mxu0 %v1662_v41  ;;  %v631_v41 = vld [vmem:[#allocation2] sm:$0xff]  ;;  %1725 = vmatprep.subr.bf16.mxu1 %v1724_v31  ;;  %v660_v9 = vld [vmem:[#allocation2 + $0xe8] sm:$0xff]  ;;  %v438_v11 = vld [vmem:[%s2788_s1 + $0x3b8] sm:$0xff] }
  0x72   : > { %1665 = vmatprep.subr.bf16.mxu0 %v1664_v42  ;;  %v635_v42 = vld [vmem:[#allocation2 + $0x20] sm:$0xff]  ;;  %v1760_v15 = vpack.c.bf16 %v660_v9, %v656_v8  ;;  %v1740_v18 = vpack.c.bf16 %v438_v11, %v434_v10  ;;  %v437_v19 = vld [vmem:[%s2788_s1 + $0x3b0] sm:$0xff]  ;;  %v664_v20 = vld [vmem:[#allocation2 + $0x108] sm:$0xff] }
  0x73   : > { %v1750_v51 = vpack.c.bf16 %v635_v42, %v631_v41  ;;  %v655_v16 = vld [vmem:[#allocation2 + $0xc0] sm:$0xff]  ;;  %v668_v21 = vld [vmem:[#allocation2 + $0x128] sm:$0xff]  ;;  %v442_v22 = vld [vmem:[%s2788_s1 + $0x3d8] sm:$0xff] }
  0x74   : > { %1727 = vmatpush1.bf16.msra.mxu1 %v1726_v38  ;;  %v659_v17 = vld [vmem:[#allocation2 + $0xe0] sm:$0xff]  ;;  %v446_v23 = vld [vmem:[%s2788_s1 + $0x3f8] sm:$0xff]  ;;  %v1764_v27 = vpack.c.bf16 %v668_v21, %v664_v20  ;;  %v445_v31 = vld [vmem:[%s2788_s1 + $0x3f0] sm:$0xff] }
  0x75   : > { %1667 = vmatpush1.bf16.msra.mxu0 %v1666_v53  ;;  %v2680_v53 = vld [vmem:[%s2406_s10 + $0x18] sm:$0xff]  ;;  %1729 = vmatprep.subr.bf16.mxu1 %v1728_v43  ;;  %v1762_v24 = vpack.c.bf16 %v659_v17, %v655_v16  ;;  %v663_v28 = vld [vmem:[#allocation2 + $0x100] sm:$0xff]  ;;  %v1744_v30 = vpack.c.bf16 %v446_v23, %v442_v22  ;;  %v672_v32 = vld [vmem:[#allocation2 + $0x148] sm:$0xff] }
  0x76   : > { %1669 = vmatprep.subr.bf16.mxu0 %v1668_v54  ;;  %v1752_v54 = vpack.c.bf16 %v644_v46, %v640_v45  ;;  %v667_v29 = vld [vmem:[#allocation2 + $0x120] sm:$0xff]  ;;  %v676_v33 = vld [vmem:[#allocation2 + $0x168] sm:$0xff]  ;;  %v634_v34 = vld [vmem:[#allocation2 + $0x18] sm:$0xff] }
  0x77   : > { %v638_v35 = vld [vmem:[#allocation2 + $0x38] sm:$0xff]  ;;  %v1766_v36 = vpack.c.bf16 %v667_v29, %v663_v28  ;;  %v1768_v38 = vpack.c.bf16 %v676_v33, %v672_v32  ;;  %v671_v39 = vld [vmem:[#allocation2 + $0x140] sm:$0xff]  ;;  %v633_v42 = vld [vmem:[#allocation2 + $0x10] sm:$0xff] }
  0x78   : > { %1731 = vmatpush1.bf16.msra.mxu1 %v1730_v52  ;;  %v1876_v41 = vpack.c.bf16 %v638_v35, %v634_v34  ;;  %v637_v43 = vld [vmem:[#allocation2 + $0x30] sm:$0xff]  ;;  %v642_v44 = vld [vmem:[#allocation2 + $0x58] sm:$0xff]  ;;  %v680_v46 = vld [vmem:[#allocation2 + $0x188] sm:$0xff] }
  0x79   : > { %1671 = vmatpush1.bf16.msra.mxu0 %v1670_v1  ;;  %v1734_v1 = vpack.c.bf16 %v421_v58, %v417_v50  ;;  %1733 = vmatprep.subr.bf16.mxu1 %v1732_v57  ;;  %v646_v45 = vld [vmem:[#allocation2 + $0x78] sm:$0xff]  ;;  %v684_v47 = vld [vmem:[#allocation2 + $0x1a8] sm:$0xff]  ;;  %v1878_v50 = vpack.c.bf16 %v637_v43, %v633_v42  ;;  %v679_v52 = vld [vmem:[#allocation2 + $0x180] sm:$0xff] }
  0x7a   : > { %1673 = vmatprep.subr.bf16.mxu0 %v1672_v2  ;;  %v425_v2 = vld [vmem:[%s2788_s1 + $0x350] sm:$0xff]  ;;  %v1880_v55 = vpack.c.bf16 %v646_v45, %v642_v44  ;;  %v1772_v57 = vpack.c.bf16 %v684_v47, %v680_v46  ;;  %v688_v58 = vld [vmem:[#allocation2 + $0x1c8] sm:$0xff]  ;;  %v650_v60 = vld [vmem:[#allocation2 + $0x98] sm:$0xff] }
  0x7b   : > { %v645_v56 = vld [vmem:[#allocation2 + $0x70] sm:$0xff]  ;;  %v692_v59 = vld [vmem:[#allocation2 + $0x1e8] sm:$0xff]  ;;  %v654_v61 = vld [vmem:[#allocation2 + $0xb8] sm:$0xff] }
  0x7c   : > { %1735 = vmatpush1.bf16.msra.mxu1 %v1734_v1  ;;  %v649_v1 = vld [vmem:[#allocation2 + $0x90] sm:$0xff]  ;;  %v691_v4 = vld [vmem:[#allocation2 + $0x1e0] sm:$0xff]  ;;  %v1884_v5 = vpack.c.bf16 %v654_v61, %v650_v60  ;;  %v700_v8 = vld [vmem:[#allocation2 + $0x228] sm:$0xff] }
  0x7d   : > { %1675 = vmatpush1.bf16.msra.mxu0 %v1674_v13  ;;  %v1738_v13 = vpack.c.bf16 %v429_v7, %v425_v2  ;;  %1737 = vmatprep.subr.bf16.mxu1 %v1736_v6  ;;  %v1776_v2 = vpack.c.bf16 %v692_v59, %v688_v58  ;;  %v653_v6 = vld [vmem:[#allocation2 + $0xb0] sm:$0xff]  ;;  %v696_v7 = vld [vmem:[#allocation2 + $0x208] sm:$0xff]  ;;  %v658_v9 = vld [vmem:[#allocation2 + $0xd8] sm:$0xff] }
  0x7e   : > { %1677 = vmatprep.subr.bf16.mxu0 %v1676_v14  ;;  %v433_v14 = vld [vmem:[%s2788_s1 + $0x390] sm:$0xff]  ;;  %v662_v10 = vld [vmem:[#allocation2 + $0xf8] sm:$0xff]  ;;  %v704_v17 = vld [vmem:[#allocation2 + $0x248] sm:$0xff] }
  0x7f   : > { %v657_v11 = vld [vmem:[#allocation2 + $0xd0] sm:$0xff]  ;;  %v670_v20 = vld [vmem:[#allocation2 + $0x138] sm:$0xff]  ;;  %v712_v28 = vld [vmem:[#allocation2 + $0x288] sm:$0xff] }
  0x80   : > { %1739 = vmatpush1.bf16.msra.mxu1 %v1738_v13  ;;  %v695_v13 = vld [vmem:[#allocation2 + $0x200] sm:$0xff]  ;;  %v661_v16 = vld [vmem:[#allocation2 + $0xf0] sm:$0xff]  ;;  %v716_v29 = vld [vmem:[#allocation2 + $0x2a8] sm:$0xff] }
  0x81   : > { %1679 = vmatpush1.bf16.msra.mxu0 %v1678_v25  ;;  %v1742_v25 = vpack.c.bf16 %v437_v19, %v433_v14  ;;  %1741 = vmatprep.subr.bf16.mxu1 %v1740_v18  ;;  %v699_v14 = vld [vmem:[#allocation2 + $0x220] sm:$0xff]  ;;  %v708_v18 = vld [vmem:[#allocation2 + $0x268] sm:$0xff]  ;;  %v666_v19 = vld [vmem:[#allocation2 + $0x118] sm:$0xff]  ;;  %v1788_v35 = vpack.c.bf16 %v716_v29, %v712_v28 }
  0x82   : > { %1681 = vmatprep.subr.bf16.mxu0 %v1680_v26  ;;  %v441_v26 = vld [vmem:[%s2788_s1 + $0x3d0] sm:$0xff]  ;;  %v1782_v21 = vpack.c.bf16 %v699_v14, %v695_v13  ;;  %v1784_v23 = vpack.c.bf16 %v708_v18, %v704_v17  ;;  %v682_v42 = vld [vmem:[#allocation2 + $0x198] sm:$0xff]  ;;  %v744_v13 = vld [vmem:[#allocation2 + $0x388] sm:$0xff] }
  0x83   : > { %v665_v22 = vld [vmem:[#allocation2 + $0x110] sm:$0xff]  ;;  %v686_v43 = vld [vmem:[#allocation2 + $0x1b8] sm:$0xff]  ;;  %v748_v14 = vld [vmem:[#allocation2 + $0x3a8] sm:$0xff] }
  0x84   : > { %1743 = vmatpush1.bf16.msra.mxu1 %v1742_v25  ;;  %v707_v25 = vld [vmem:[#allocation2 + $0x260] sm:$0xff]  ;;  %v673_v34 = vld [vmem:[#allocation2 + $0x150] sm:$0xff] }
  0x85   : > { %1683 = vmatpush1.bf16.msra.mxu0 %v1682_v37  ;;  %v1746_v37 = vpack.c.bf16 %v445_v31, %v441_v26  ;;  %1745 = vmatprep.subr.bf16.mxu1 %v1744_v30  ;;  %v1892_v26 = vpack.c.bf16 %v670_v20, %v666_v19  ;;  %v674_v30 = vld [vmem:[#allocation2 + $0x158] sm:$0xff]  ;;  %v681_v46 = vld [vmem:[#allocation2 + $0x190] sm:$0xff]  ;;  %v1804_v19 = vpack.c.bf16 %v748_v14, %v744_v13  ;;  %v743_v20 = vld [vmem:[#allocation2 + $0x380] sm:$0xff] }
  0x86   : > { %1749 = vmatprep.subr.bf16.mxu0 %v1748_v40  ;;  %v675_v40 = vld [vmem:[#allocation2 + $0x160] sm:$0xff]  ;;  %v678_v31 = vld [vmem:[#allocation2 + $0x178] sm:$0xff]  ;;  %v689_v60 = vld [vmem:[#allocation2 + $0x1d0] sm:$0xff] }
  0x87   : > { %v1770_v48 = vpack.c.bf16 %v675_v40, %v671_v39  ;;  %v677_v39 = vld [vmem:[#allocation2 + $0x170] sm:$0xff]  ;;  %v720_v40 = vld [vmem:[#allocation2 + $0x2c8] sm:$0xff]  ;;  %v2736_v14 = vld [vmem:[%s2789_s2] sm:$0xf] }
  0x88   : > { %534 = vmatmul.mubr.f32.vlgmr.msra.gmra.mrb[0].mxu0 %v2674_v49  ;;  %1747 = vmatpush1.bf16.msra.mxu1 %v1746_v37  ;;  %v715_v37 = vld [vmem:[#allocation2 + $0x2a0] sm:$0xff]  ;;  %v1898_v45 = vpack.c.bf16 %v677_v39, %v673_v34  ;;  %v713_v29 = vld [vmem:[#allocation2 + $0x290] sm:$0xff] }
  0x89   : > { %539 = vmatprep.mubr.f32.mxu0 %v2680_v53  ;;  %1751 = vmatpush1.bf16.msra.mxu0 %v1750_v51  ;;  %v641_v51 = vld [vmem:[#allocation2 + $0x50] sm:$0xff] }
  0x8a   : > { %1753 = vmatprep.subr.bf16.mxu0 %v1752_v54  ;;  %v683_v54 = vld [vmem:[#allocation2 + $0x1a0] sm:$0xff]  ;;  %1877 = vmatprep.subr.bf16.mxu1 %v1876_v41  ;;  %v724_v41 = vld [vmem:[#allocation2 + $0x2e8] sm:$0xff] }
  0x8b   : > { %611 = vmatmul.mubr.f32.vlgmr.msra.gmra.mrb[0].mxu1 %v2674_v49  ;;  %v1774_v62 = vpack.c.bf16 %v683_v54, %v679_v52  ;;  %v1792_v47 = vpack.c.bf16 %v724_v41, %v720_v40  ;;  %v685_v52 = vld [vmem:[#allocation2 + $0x1b0] sm:$0xff]  ;;  %v728_v54 = vld [vmem:[#allocation2 + $0x308] sm:$0xff] }
  0x8c   : > { %540 = vmatmul.mubr.f32.gmra.mrb[2].mxu0 %v2694_v63  ;;  %616 = vmatprep.mubr.f32.mxu1 %v2680_v53  ;;  %v1886_v53 = vpack.c.bf16 %v653_v6, %v649_v1  ;;  %v1902_v59 = vpack.c.bf16 %v685_v52, %v681_v46  ;;  %v702_v6 = vld [vmem:[#allocation2 + $0x238] sm:$0xff]  ;;  %v729_v41 = vld [vmem:[#allocation2 + $0x310] sm:$0xff] }
  0x8d   : > { %1755 = vmatpush1.bf16.msra.mxu0 %v1754_v0  ;;  %1879 = vmatpush1.bf16.msra.mxu1 %v1878_v50  ;;  %v1882_v0 = vpack.c.bf16 %v645_v56, %v641_v51  ;;  %v723_v50 = vld [vmem:[#allocation2 + $0x2e0] sm:$0xff]  ;;  %v1900_v51 = vpack.c.bf16 %v686_v43, %v682_v42  ;;  %v690_v56 = vld [vmem:[#allocation2 + $0x1d8] sm:$0xff]  ;;  %v733_v42 = vld [vmem:[#allocation2 + $0x330] sm:$0xff] }
  0x8e   : > { %1757 = vmatprep.subr.bf16.mxu0 %v1756_v3  ;;  %v687_v3 = vld [vmem:[#allocation2 + $0x1c0] sm:$0xff]  ;;  %1881 = vmatprep.subr.bf16.mxu1 %v1880_v55  ;;  %v732_v55 = vld [vmem:[#allocation2 + $0x328] sm:$0xff]  ;;  %v738_v43 = vld [vmem:[#allocation2 + $0x358] sm:$0xff] }
  0x8f   : > { %617 = vmatmul.mubr.f32.gmra.mrb[2].mxu1 %v2694_v63  ;;  %v1778_v49 = vpack.c.bf16 %v691_v4, %v687_v3  ;;  %v1890_v63 = vpack.c.bf16 %v661_v16, %v657_v11  ;;  %v1796_v61 = vpack.c.bf16 %v732_v55, %v728_v54  ;;  %v736_v3 = vld [vmem:[#allocation2 + $0x348] sm:$0xff]  ;;  %v710_v16 = vld [vmem:[#allocation2 + $0x278] sm:$0xff]  ;;  %v745_v55 = vld [vmem:[#allocation2 + $0x390] sm:$0xff] }
  0x90   : > { %v740_v4 = vld [vmem:[#allocation2 + $0x368] sm:$0xff] }
  0x91   : > { %1759 = vmatpush1.bf16.msra.mxu0 %v1758_v12  ;;  %1883 = vmatpush1.bf16.msra.mxu1 %v1882_v0  ;;  %v1780_v12 = vpack.c.bf16 %v700_v8, %v696_v7  ;;  %v731_v0 = vld [vmem:[#allocation2 + $0x320] sm:$0xff] }
  0x92   : > { %1761 = vmatprep.subr.bf16.mxu0 %v1760_v15  ;;  %1885 = vmatprep.subr.bf16.mxu1 %v1884_v5  ;;  %v1888_v15 = vpack.c.bf16 %v662_v10, %v658_v9  ;;  %v698_v5 = vld [vmem:[#allocation2 + $0x218] sm:$0xff]  ;;  %v697_v9 = vld [vmem:[#allocation2 + $0x210] sm:$0xff]  ;;  %v1800_v10 = vpack.c.bf16 %v740_v4, %v736_v3 }
  0x93   : > { %v1908_v11 = vpack.c.bf16 %v702_v6, %v698_v5  ;;  %v753_v4 = vld [vmem:[#allocation2 + $0x3d0] sm:$0xff] }
  0x94   : > { %v757_v5 = vld [vmem:[#allocation2 + $0x3f0] sm:$0xff] }
  0x95   : > { %1763 = vmatpush1.bf16.msra.mxu0 %v1762_v24  ;;  %1887 = vmatpush1.bf16.msra.mxu1 %v1886_v53  ;;  %v703_v24 = vld [vmem:[#allocation2 + $0x240] sm:$0xff]  ;;  %v1938_v6 = vpack.c.bf16 %v757_v5, %v753_v4 }
  0x96   : > { %1765 = vmatprep.subr.bf16.mxu0 %v1764_v27  ;;  %1889 = vmatprep.subr.bf16.mxu1 %v1888_v15  ;;  %v669_v27 = vld [vmem:[#allocation2 + $0x130] sm:$0xff]  ;;  %v1786_v32 = vpack.c.bf16 %v707_v25, %v703_v24  ;;  %v739_v53 = vld [vmem:[#allocation2 + $0x360] sm:$0xff]  ;;  %v706_v15 = vld [vmem:[#allocation2 + $0x258] sm:$0xff] }
  0x97   : > { %v1894_v33 = vpack.c.bf16 %v669_v27, %v665_v22  ;;  %v705_v22 = vld [vmem:[#allocation2 + $0x250] sm:$0xff]  ;;  %v714_v24 = vld [vmem:[#allocation2 + $0x298] sm:$0xff] }
  0x98   : > { %v718_v25 = vld [vmem:[#allocation2 + $0x2b8] sm:$0xff] }
  0x99   : > { %1767 = vmatpush1.bf16.msra.mxu0 %v1766_v36  ;;  %1891 = vmatpush1.bf16.msra.mxu1 %v1890_v63  ;;  %v711_v36 = vld [vmem:[#allocation2 + $0x280] sm:$0xff]  ;;  %v1912_v63 = vpack.c.bf16 %v710_v16, %v706_v15  ;;  %v1916_v28 = vpack.c.bf16 %v718_v25, %v714_v24  ;;  %v768_v24 = vld [vmem:[#allocation2 + $0x448] sm:$0xff] }
  0x9a   : > { %1769 = vmatprep.subr.bf16.mxu0 %v1768_v38  ;;  %1893 = vmatprep.subr.bf16.mxu1 %v1892_v26  ;;  %v1896_v38 = vpack.c.bf16 %v678_v31, %v674_v30  ;;  %v1790_v44 = vpack.c.bf16 %v715_v37, %v711_v36  ;;  %v717_v30 = vld [vmem:[#allocation2 + $0x2b0] sm:$0xff]  ;;  %v722_v31 = vld [vmem:[#allocation2 + $0x2d8] sm:$0xff] }
  0x9b   : > { %v725_v36 = vld [vmem:[#allocation2 + $0x2f0] sm:$0xff]  ;;  %v730_v37 = vld [vmem:[#allocation2 + $0x318] sm:$0xff] }
  0x9d   : > { %1771 = vmatpush1.bf16.msra.mxu0 %v1770_v48  ;;  %1895 = vmatpush1.bf16.msra.mxu1 %v1894_v33  ;;  %v719_v48 = vld [vmem:[#allocation2 + $0x2c0] sm:$0xff]  ;;  %v1918_v33 = vpack.c.bf16 %v717_v30, %v713_v29 }
  0x9e   : > { %1773 = vmatprep.subr.bf16.mxu0 %v1772_v57  ;;  %1897 = vmatprep.subr.bf16.mxu1 %v1896_v38  ;;  %v694_v57 = vld [vmem:[#allocation2 + $0x1f8] sm:$0xff]  ;;  %v1794_v58 = vpack.c.bf16 %v723_v50, %v719_v48  ;;  %v741_v48 = vld [vmem:[#allocation2 + $0x370] sm:$0xff] }
  0x9f   : > { %v1904_v1 = vpack.c.bf16 %v694_v57, %v690_v56  ;;  %v734_v38 = vld [vmem:[#allocation2 + $0x338] sm:$0xff]  ;;  %v749_v56 = vld [vmem:[#allocation2 + $0x3b0] sm:$0xff] }
  0xa0   : > { %v1924_v40 = vpack.c.bf16 %v734_v38, %v730_v37  ;;  %v746_v50 = vld [vmem:[#allocation2 + $0x398] sm:$0xff]  ;;  %v1934_v57 = vpack.c.bf16 %v749_v56, %v745_v55  ;;  %v769_v38 = vld [vmem:[#allocation2 + $0x450] sm:$0xff] }
  0xa1   : > { %1775 = vmatpush1.bf16.msra.mxu0 %v1774_v62  ;;  %1899 = vmatpush1.bf16.msra.mxu1 %v1898_v45  ;;  %v727_v62 = vld [vmem:[#allocation2 + $0x300] sm:$0xff]  ;;  %v1926_v45 = vpack.c.bf16 %v733_v42, %v729_v41 }
  0xa2   : > { %1777 = vmatprep.subr.bf16.mxu0 %v1776_v2  ;;  %1901 = vmatprep.subr.bf16.mxu1 %v1900_v51  ;;  %v693_v2 = vld [vmem:[#allocation2 + $0x1f0] sm:$0xff]  ;;  %v1798_v7 = vpack.c.bf16 %v731_v0, %v727_v62  ;;  %v750_v51 = vld [vmem:[#allocation2 + $0x3b8] sm:$0xff]  ;;  %v751_v0 = vld [vmem:[#allocation2 + $0x3c0] sm:$0xff] }
  0xa3   : > { %v1906_v8 = vpack.c.bf16 %v693_v2, %v689_v60  ;;  %v1932_v54 = vpack.c.bf16 %v750_v51, %v746_v50  ;;  %v754_v60 = vld [vmem:[#allocation2 + $0x3d8] sm:$0xff]  ;;  %v775_v51 = vld [vmem:[#allocation2 + $0x480] sm:$0xff] }
  0xa4   : > { %v758_v62 = vld [vmem:[#allocation2 + $0x3f8] sm:$0xff] }
  0xa5   : > { %1779 = vmatpush1.bf16.msra.mxu0 %v1778_v49  ;;  %1903 = vmatpush1.bf16.msra.mxu1 %v1902_v59  ;;  %v735_v49 = vld [vmem:[#allocation2 + $0x340] sm:$0xff]  ;;  %v756_v59 = vld [vmem:[#allocation2 + $0x3e8] sm:$0xff]  ;;  %v1936_v2 = vpack.c.bf16 %v758_v62, %v754_v60  ;;  %v790_v62 = vld [vmem:[#allocation2 + $0x4f8] sm:$0xff] }
  0xa6   : > { %1781 = vmatprep.subr.bf16.mxu0 %v1780_v12  ;;  %1905 = vmatprep.subr.bf16.mxu1 %v1904_v1  ;;  %v701_v12 = vld [vmem:[#allocation2 + $0x230] sm:$0xff]  ;;  %v1802_v17 = vpack.c.bf16 %v739_v53, %v735_v49  ;;  %v755_v1 = vld [vmem:[#allocation2 + $0x3e0] sm:$0xff]  ;;  %v766_v49 = vld [vmem:[#allocation2 + $0x438] sm:$0xff] }
  0xa7   : > { %v1910_v18 = vpack.c.bf16 %v701_v12, %v697_v9  ;;  %v1810_v3 = vpack.c.bf16 %v755_v1, %v751_v0  ;;  %v762_v9 = vld [vmem:[#allocation2 + $0x418] sm:$0xff]  ;;  %v788_v60 = vld [vmem:[#allocation2 + $0x4e8] sm:$0xff] }
  0xa8   : > { %v1940_v53 = vpack.c.bf16 %v766_v49, %v762_v9  ;;  %v796_v9 = vld [vmem:[#allocation2 + $0x528] sm:$0xff]  ;;  %v798_v49 = vld [vmem:[#allocation2 + $0x538] sm:$0xff] }
  0xa9   : > { %1783 = vmatpush1.bf16.msra.mxu0 %v1782_v21  ;;  %1907 = vmatpush1.bf16.msra.mxu1 %v1906_v8  ;;  %v747_v21 = vld [vmem:[#allocation2 + $0x3a0] sm:$0xff]  ;;  %v764_v8 = vld [vmem:[#allocation2 + $0x428] sm:$0xff] }
  0xaa   : > { %1785 = vmatprep.subr.bf16.mxu0 %v1784_v23  ;;  %1909 = vmatprep.subr.bf16.mxu1 %v1908_v11  ;;  %v709_v23 = vld [vmem:[#allocation2 + $0x270] sm:$0xff]  ;;  %v1806_v26 = vpack.c.bf16 %v747_v21, %v743_v20  ;;  %v449_v11 = vlaneseq  ;;  %v763_v20 = vld [vmem:[#allocation2 + $0x420] sm:$0xff] }
  0xab   : > { %v1914_v27 = vpack.c.bf16 %v709_v23, %v705_v22  ;;  %v761_v22 = vld [vmem:[#allocation2 + $0x410] sm:$0xff] }
  0xac   : > { %v2730_v12 = vshrl.u32 %v449_v11, 7  ;;  %v765_v23 = vld [vmem:[#allocation2 + $0x430] sm:$0xff] }
  0xad   : > { %1787 = vmatpush1.bf16.msra.mxu0 %v1786_v32  ;;  %1911 = vmatpush1.bf16.msra.mxu1 %v1910_v18  ;;  %v726_v32 = vld [vmem:[#allocation2 + $0x2f8] sm:$0xff] }
  0xae   : > { %1789 = vmatprep.subr.bf16.mxu0 %v1788_v35  ;;  %1913 = vmatprep.subr.bf16.mxu1 %v1912_v63  ;;  %v1920_v34 = vpack.c.bf16 %v726_v32, %v722_v31  ;;  %v721_v35 = vld [vmem:[#allocation2 + $0x2d0] sm:$0xff]  ;;  %v451_v13 = vsub.s32 0, %v2730_v12  ;;  %v455_v15 = vsub.s32 1, %v2730_v12  ;;  %v1942_v31 = vpack.c.bf16 %v765_v23, %v761_v22  ;;  %v767_v32 = vld [vmem:[#allocation2 + $0x440] sm:$0xff]  ;;  %v800_v22 = vld [vmem:[#allocation2 + $0x548] sm:$0xff] }
  0xaf   : > { %v1922_v39 = vpack.c.bf16 %v725_v36, %v721_v35  ;;  %v804_v23 = vld [vmem:[#allocation2 + $0x568] sm:$0xff] }
  0xb0   : > { %v452_v16 = vrot.slane %v2736_v14, %v451_v13 }
  0xb1   : > { %1791 = vmatpush1.bf16.msra.mxu0 %v1790_v44  ;;  %1915 = vmatpush1.bf16.msra.mxu1 %v1914_v27  ;;  %v742_v44 = vld [vmem:[#allocation2 + $0x378] sm:$0xff] }
  0xb2   : > { %1793 = vmatprep.subr.bf16.mxu0 %v1792_v47  ;;  %1917 = vmatprep.subr.bf16.mxu1 %v1916_v28  ;;  %v1928_v46 = vpack.c.bf16 %v742_v44, %v738_v43  ;;  %v737_v47 = vld [vmem:[#allocation2 + $0x350] sm:$0xff]  ;;  %v770_v27 = vld [vmem:[#allocation2 + $0x458] sm:$0xff]  ;;  %v780_v43 = vld [vmem:[#allocation2 + $0x4a8] sm:$0xff] }
  0xb3   : > { %v1930_v52 = vpack.c.bf16 %v741_v48, %v737_v47  ;;  %v774_v28 = vld [vmem:[#allocation2 + $0x478] sm:$0xff] }
  0xb4   : > { %v1944_v37 = vpack.c.bf16 %v774_v28, %v770_v27  ;;  %v778_v44 = vld [vmem:[#allocation2 + $0x498] sm:$0xff] }
  0xb5   : > { %1795 = vmatpush1.bf16.msra.mxu0 %v1794_v58  ;;  %1919 = vmatpush1.bf16.msra.mxu1 %v1918_v33  ;;  %v752_v58 = vld [vmem:[#allocation2 + $0x3c8] sm:$0xff]  ;;  %v771_v33 = vld [vmem:[#allocation2 + $0x460] sm:$0xff] }
  0xb6   : > { %1797 = vmatprep.subr.bf16.mxu0 %v1796_v61  ;;  %1921 = vmatprep.subr.bf16.mxu1 %v1920_v34  ;;  %v1808_v61 = vpack.c.bf16 %v756_v59, %v752_v58  ;;  %v1818_v48 = vpack.c.bf16 %v771_v33, %v767_v32  ;;  %v781_v58 = vld [vmem:[#allocation2 + $0x4b0] sm:$0xff]  ;;  %v784_v59 = vld [vmem:[#allocation2 + $0x4c8] sm:$0xff] }
  0xb7   : > { %v1824_v4 = vpack.c.bf16 %v788_v60, %v784_v59  ;;  %v801_v33 = vld [vmem:[#allocation2 + $0x550] sm:$0xff] }
  0xb9   : > { %1799 = vmatpush1.bf16.msra.mxu0 %v1798_v7  ;;  %1923 = vmatpush1.bf16.msra.mxu1 %v1922_v39  ;;  %v760_v7 = vld [vmem:[#allocation2 + $0x408] sm:$0xff]  ;;  %v773_v39 = vld [vmem:[#allocation2 + $0x470] sm:$0xff] }
  0xba   : > { %1801 = vmatprep.subr.bf16.mxu0 %v1800_v10  ;;  %1925 = vmatprep.subr.bf16.mxu1 %v1924_v40  ;;  %v1812_v10 = vpack.c.bf16 %v764_v8, %v760_v7  ;;  %v776_v40 = vld [vmem:[#allocation2 + $0x488] sm:$0xff]  ;;  %v1946_v50 = vpack.c.bf16 %v773_v39, %v769_v38  ;;  %v789_v7 = vld [vmem:[#allocation2 + $0x4f0] sm:$0xff]  ;;  %v810_v38 = vld [vmem:[#allocation2 + $0x598] sm:$0xff] }
  0xbb   : > { %v1820_v55 = vpack.c.bf16 %v780_v43, %v776_v40  ;;  %v792_v8 = vld [vmem:[#allocation2 + $0x508] sm:$0xff]  ;;  %v814_v39 = vld [vmem:[#allocation2 + $0x5b8] sm:$0xff] }
  0xbd   : > { %1803 = vmatpush1.bf16.msra.mxu0 %v1802_v17  ;;  %1927 = vmatpush1.bf16.msra.mxu1 %v1926_v45  ;;  %v456_v17 = vrot.slane %v2736_v14, %v455_v15  ;;  %v782_v45 = vld [vmem:[#allocation2 + $0x4b8] sm:$0xff] }
  0xbe   : > { %1805 = vmatprep.subr.bf16.mxu0 %v1804_v19  ;;  %1929 = vmatprep.subr.bf16.mxu1 %v1928_v46  ;;  %v759_v19 = vld [vmem:[#allocation2 + $0x400] sm:$0xff]  ;;  %v1948_v56 = vpack.c.bf16 %v782_v45, %v778_v44 }
  0xbf   : > { %v1814_v30 = vpack.c.bf16 %v763_v20, %v759_v19  ;;  %v1828_v19 = vpack.c.bf16 %v796_v9, %v792_v8  ;;  %v807_v44 = vld [vmem:[#allocation2 + $0x580] sm:$0xff] }
  0xc0   : > { %v811_v45 = vld [vmem:[#allocation2 + $0x5a0] sm:$0xff] }
  0xc1   : > { %1807 = vmatpush1.bf16.msra.mxu0 %v1806_v26  ;;  %1931 = vmatpush1.bf16.msra.mxu1 %v1930_v52  ;;  %v772_v26 = vld [vmem:[#allocation2 + $0x468] sm:$0xff]  ;;  %v779_v52 = vld [vmem:[#allocation2 + $0x4a0] sm:$0xff]  ;;  %v1838_v59 = vpack.c.bf16 %v811_v45, %v807_v44 }
  0xc2   : > { %1933 = vmatprep.subr.bf16.mxu1 %v1932_v54  ;;  %1809 = vmatprep.subr.bf16.mxu0 %v1808_v61  ;;  %v1816_v36 = vpack.c.bf16 %v772_v26, %v768_v24  ;;  %v786_v61 = vld [vmem:[#allocation2 + $0x4d8] sm:$0xff]  ;;  %v1822_v0 = vpack.c.bf16 %v779_v52, %v775_v51  ;;  %v816_v51 = vld [vmem:[#allocation2 + $0x5c8] sm:$0xff] }
  0xc3   : > { %v1952_v5 = vpack.c.bf16 %v790_v62, %v786_v61  ;;  %v802_v24 = vld [vmem:[#allocation2 + $0x558] sm:$0xff]  ;;  %v815_v61 = vld [vmem:[#allocation2 + $0x5c0] sm:$0xff]  ;;  %v848_v44 = vld [vmem:[#allocation2 + $0x6c8] sm:$0xff] }
  0xc4   : > { %v819_v62 = vld [vmem:[#allocation2 + $0x5e0] sm:$0xff]  ;;  %v852_v45 = vld [vmem:[#allocation2 + $0x6e8] sm:$0xff] }
  0xc5   : > { %1935 = vmatpush1.bf16.msra.mxu1 %v1934_v57  ;;  %1811 = vmatpush1.bf16.msra.mxu0 %v1810_v3  ;;  %v777_v57 = vld [vmem:[#allocation2 + $0x490] sm:$0xff]  ;;  %v787_v3 = vld [vmem:[#allocation2 + $0x4e0] sm:$0xff]  ;;  %v1842_v8 = vpack.c.bf16 %v819_v62, %v815_v61  ;;  %v860_v61 = vld [vmem:[#allocation2 + $0x728] sm:$0xff] }
  0xc6   : > { %1937 = vmatprep.subr.bf16.mxu1 %v1936_v2  ;;  %1813 = vmatprep.subr.bf16.mxu0 %v1812_v10  ;;  %v1950_v1 = vpack.c.bf16 %v781_v58, %v777_v57  ;;  %v783_v2 = vld [vmem:[#allocation2 + $0x4c0] sm:$0xff]  ;;  %v794_v10 = vld [vmem:[#allocation2 + $0x518] sm:$0xff] }
  0xc7   : > { %v1826_v11 = vpack.c.bf16 %v787_v3, %v783_v2  ;;  %v1956_v20 = vpack.c.bf16 %v798_v49, %v794_v10  ;;  %v822_v57 = vld [vmem:[#allocation2 + $0x5f8] sm:$0xff]  ;;  %v817_v2 = vld [vmem:[#allocation2 + $0x5d0] sm:$0xff]  ;;  %v823_v10 = vld [vmem:[#allocation2 + $0x600] sm:$0xff] }
  0xc8   : > { %v821_v3 = vld [vmem:[#allocation2 + $0x5f0] sm:$0xff]  ;;  %v827_v49 = vld [vmem:[#allocation2 + $0x620] sm:$0xff]  ;;  %v858_v62 = vld [vmem:[#allocation2 + $0x718] sm:$0xff] }
  0xc9   : > { %1939 = vmatpush1.bf16.msra.mxu1 %v1938_v6  ;;  %v785_v6 = vld [vmem:[#allocation2 + $0x4d0] sm:$0xff]  ;;  %v1970_v9 = vpack.c.bf16 %v821_v3, %v817_v2  ;;  %v855_v3 = vld [vmem:[#allocation2 + $0x700] sm:$0xff] }
  0xca   : > { %1941 = vmatprep.subr.bf16.mxu1 %v1940_v53  ;;  %v463_v53 = vsub.s32 3, %v2730_v12 }
  0xcc   : > { %v2749_v26 = vrot.slane %v2736_v14, %v463_v53 }
 0x15b   : > { %v535_v18 = vpop.f32.mrb[0].mxu0 }
 0x15c   : > { %v536_v21 = vadd.f32 %v535_v18, %v452_v16  ;;  %v537_v63 = vpop.f32.mrb[1].mxu0  ;;  %v795_v18 = vld [vmem:[#allocation2 + $0x520] sm:$0xff] }
 0x15d   : > { %v538_v25 = vadd.f32 %v537_v63, %v456_v17  ;;  %v797_v63 = vld [vmem:[#allocation2 + $0x530] sm:$0xff] }
 0x15e   : > { %v623_v35 = vmax.f32 %v536_v21, 0.0  ;;  %v793_v21 = vld [vmem:[#allocation2 + $0x510] sm:$0xff] }
 0x15f   : > { %v624_v29 = vmax.f32 %v538_v25, 0.0  ;;  %v541_v34 = vpop.f32.mrb[2].mxu0  ;;  %v806_v25 = vld [vmem:[#allocation2 + $0x578] sm:$0xff]  ;;  %v1958_v28 = vpack.c.bf16 %v797_v63, %v793_v21 }
 0x160   : > { %v542_v41 = vadd.f32 %v541_v34, %v452_v16  ;;  %v543_v42 = vpop.f32.mrb[3].mxu0  ;;  %v1954_v16 = vpack.c.bf16 %v789_v7, %v785_v6  ;;  %v1960_v32 = vpack.c.bf16 %v806_v25, %v802_v24  ;;  %v805_v34 = vld [vmem:[#allocation2 + $0x570] sm:$0xff]  ;;  %v826_v6 = vld [vmem:[#allocation2 + $0x618] sm:$0xff]  ;;  %v831_v24 = vld [vmem:[#allocation2 + $0x640] sm:$0xff] }
 0x161   : > { %973 = vmatprep.mubr.f32.mxu0 %v624_v29  ;;  %1127 = vmatprep.mubr.f32.mxu1 %v624_v29  ;;  %v544_v46 = vadd.f32 %v543_v42, %v456_v17  ;;  %v791_v17 = vld [vmem:[#allocation2 + $0x500] sm:$0xff]  ;;  %v1962_v43 = vpack.c.bf16 %v805_v34, %v801_v33  ;;  %v830_v7 = vld [vmem:[#allocation2 + $0x638] sm:$0xff] }
 0x162   : > { %974 = vmatmul.mubr.f32.vlgmr.msra.gmra.mrb[4].mxu0 %v623_v35  ;;  %1128 = vmatmul.mubr.f32.vlgmr.msra.gmra.mrb[4].mxu1 %v623_v35  ;;  %v627_v47 = vmax.f32 %v542_v41, 0.0  ;;  %v1830_v27 = vpack.c.bf16 %v795_v18, %v791_v17  ;;  %v799_v29 = vld [vmem:[#allocation2 + $0x540] sm:$0xff]  ;;  %v808_v35 = vld [vmem:[#allocation2 + $0x588] sm:$0xff]  ;;  %v825_v17 = vld [vmem:[#allocation2 + $0x610] sm:$0xff] }
 0x163   : > { %1815 = vmatpush1.bf16.msra.mxu0 %v1814_v30  ;;  %1943 = vmatpush1.bf16.msra.mxu1 %v1942_v31  ;;  %v628_v54 = vmax.f32 %v544_v46, 0.0  ;;  %v803_v30 = vld [vmem:[#allocation2 + $0x560] sm:$0xff]  ;;  %v1832_v31 = vpack.c.bf16 %v804_v23, %v800_v22  ;;  %v829_v18 = vld [vmem:[#allocation2 + $0x630] sm:$0xff]  ;;  %v834_v21 = vld [vmem:[#allocation2 + $0x658] sm:$0xff]  ;;  %v1846_v22 = vpack.c.bf16 %v827_v49, %v823_v10 }
 0x164   : > { %1817 = vmatprep.subr.bf16.mxu0 %v1816_v36  ;;  %1945 = vmatprep.subr.bf16.mxu1 %v1944_v37  ;;  %v2751_v36 = vpop.f32.mrb[0].mxu1  ;;  %v812_v37 = vld [vmem:[#allocation2 + $0x5a8] sm:$0xff]  ;;  %v1834_v42 = vpack.c.bf16 %v803_v30, %v799_v29  ;;  %v838_v63 = vld [vmem:[#allocation2 + $0x678] sm:$0xff]  ;;  %v1974_v23 = vpack.c.bf16 %v829_v18, %v825_v17  ;;  %v835_v25 = vld [vmem:[#allocation2 + $0x660] sm:$0xff] }
 0x165   : > { %979 = vmatprep.mubr.f32.mxu0 %v628_v54  ;;  %1133 = vmatprep.mubr.f32.mxu1 %v628_v54  ;;  %v614_v40 = vpop.f32.mrb[1].mxu1  ;;  %v1836_v46 = vpack.c.bf16 %v812_v37, %v808_v35  ;;  %v833_v29 = vld [vmem:[#allocation2 + $0x650] sm:$0xff]  ;;  %v842_v33 = vld [vmem:[#allocation2 + $0x698] sm:$0xff]  ;;  %v1850_v35 = vpack.c.bf16 %v835_v25, %v831_v24  ;;  %v868_v10 = vld [vmem:[#allocation2 + $0x768] sm:$0xff] }
 0x166   : > { %980 = vmatmul.mubr.f32.gmra.mrb[6].mxu0 %v627_v47  ;;  %1134 = vmatmul.mubr.f32.gmra.mrb[6].mxu1 %v627_v47  ;;  %v615_v41 = vadd.f32 %v614_v40, %v2749_v26  ;;  %v1964_v47 = vpack.c.bf16 %v814_v39, %v810_v38  ;;  %v2754_v54 = vpop.f32.mrb[2].mxu1  ;;  %v837_v30 = vld [vmem:[#allocation2 + $0x670] sm:$0xff]  ;;  %v846_v34 = vld [vmem:[#allocation2 + $0x6b8] sm:$0xff]  ;;  %v839_v38 = vld [vmem:[#allocation2 + $0x680] sm:$0xff] }
 0x167   : > { %1819 = vmatpush1.bf16.msra.mxu0 %v1818_v48  ;;  %1947 = vmatpush1.bf16.msra.mxu1 %v1946_v50  ;;  %v809_v48 = vld [vmem:[#allocation2 + $0x590] sm:$0xff]  ;;  %v2756_v58 = vpop.f32.mrb[3].mxu1  ;;  %v1978_v37 = vpack.c.bf16 %v837_v30, %v833_v29  ;;  %v843_v39 = vld [vmem:[#allocation2 + $0x6a0] sm:$0xff]  ;;  %v866_v49 = vld [vmem:[#allocation2 + $0x758] sm:$0xff] }
 0x168   : > { %1821 = vmatprep.subr.bf16.mxu0 %v1820_v55  ;;  %1949 = vmatprep.subr.bf16.mxu1 %v1948_v56  ;;  %v813_v50 = vld [vmem:[#allocation2 + $0x5b0] sm:$0xff]  ;;  %v626_v52 = vmax.f32 %v615_v41, 0.0  ;;  %v820_v55 = vld [vmem:[#allocation2 + $0x5e8] sm:$0xff]  ;;  %v818_v56 = vld [vmem:[#allocation2 + $0x5d8] sm:$0xff]  ;;  %v1980_v41 = vpack.c.bf16 %v846_v34, %v842_v33 }
 0x169   : > { %v1966_v60 = vpack.c.bf16 %v813_v50, %v809_v48  ;;  %v1854_v48 = vpack.c.bf16 %v843_v39, %v839_v38  ;;  %v863_v18 = vld [vmem:[#allocation2 + $0x740] sm:$0xff]  ;;  %v876_v24 = vld [vmem:[#allocation2 + $0x7a8] sm:$0xff]  ;;  %v874_v25 = vld [vmem:[#allocation2 + $0x798] sm:$0xff] }
 0x16a   : > { %1050 = vmatprep.mubr.f32.mxu0 %v626_v52  ;;  %1204 = vmatprep.mubr.f32.mxu1 %v626_v52  ;;  %v851_v52 = vld [vmem:[#allocation2 + $0x6e0] sm:$0xff]  ;;  %v880_v38 = vld [vmem:[#allocation2 + $0x7c8] sm:$0xff] }
 0x16b   : > { %1823 = vmatpush1.bf16.msra.mxu0 %v1822_v0  ;;  %1951 = vmatpush1.bf16.msra.mxu1 %v1950_v1  ;;  %v1840_v0 = vpack.c.bf16 %v820_v55, %v816_v51  ;;  %v1968_v1 = vpack.c.bf16 %v822_v57, %v818_v56  ;;  %v847_v51 = vld [vmem:[#allocation2 + $0x6c0] sm:$0xff]  ;;  %v1856_v55 = vpack.c.bf16 %v852_v45, %v848_v44  ;;  %v849_v57 = vld [vmem:[#allocation2 + $0x6d0] sm:$0xff]  ;;  %v884_v39 = vld [vmem:[#allocation2 + $0x7e8] sm:$0xff] }
 0x16c   : > { %1825 = vmatprep.subr.bf16.mxu0 %v1824_v4  ;;  %1953 = vmatprep.subr.bf16.mxu1 %v1952_v5  ;;  %v824_v4 = vld [vmem:[#allocation2 + $0x608] sm:$0xff]  ;;  %v871_v30 = vld [vmem:[#allocation2 + $0x780] sm:$0xff] }
 0x16d   : > { %v828_v5 = vld [vmem:[#allocation2 + $0x628] sm:$0xff]  ;;  %v879_v44 = vld [vmem:[#allocation2 + $0x7c0] sm:$0xff] }
 0x16e   : > { %v883_v45 = vld [vmem:[#allocation2 + $0x7e0] sm:$0xff] }
 0x16f   : > { %1827 = vmatpush1.bf16.msra.mxu0 %v1826_v11  ;;  %1955 = vmatpush1.bf16.msra.mxu1 %v1954_v16  ;;  %v1844_v11 = vpack.c.bf16 %v828_v5, %v824_v4  ;;  %v1972_v16 = vpack.c.bf16 %v830_v7, %v826_v6  ;;  %v859_v4 = vld [vmem:[#allocation2 + $0x720] sm:$0xff]  ;;  %v857_v7 = vld [vmem:[#allocation2 + $0x710] sm:$0xff] }
 0x170   : > { %1829 = vmatprep.subr.bf16.mxu0 %v1828_v19  ;;  %1957 = vmatprep.subr.bf16.mxu1 %v1956_v20  ;;  %v832_v19 = vld [vmem:[#allocation2 + $0x648] sm:$0xff] }
 0x171   : > { %v836_v20 = vld [vmem:[#allocation2 + $0x668] sm:$0xff] }
 0x173   : > { %1831 = vmatpush1.bf16.msra.mxu0 %v1830_v27  ;;  %1959 = vmatpush1.bf16.msra.mxu1 %v1958_v28  ;;  %v1848_v27 = vpack.c.bf16 %v836_v20, %v832_v19  ;;  %v1976_v28 = vpack.c.bf16 %v838_v63, %v834_v21  ;;  %v867_v19 = vld [vmem:[#allocation2 + $0x760] sm:$0xff]  ;;  %v865_v63 = vld [vmem:[#allocation2 + $0x750] sm:$0xff] }
 0x174   : > { %1833 = vmatprep.subr.bf16.mxu0 %v1832_v31  ;;  %1961 = vmatprep.subr.bf16.mxu1 %v1960_v32  ;;  %v840_v31 = vld [vmem:[#allocation2 + $0x688] sm:$0xff] }
 0x175   : > { %v844_v32 = vld [vmem:[#allocation2 + $0x6a8] sm:$0xff] }
 0x176   : > { %v1852_v40 = vpack.c.bf16 %v844_v32, %v840_v31  ;;  %v875_v31 = vld [vmem:[#allocation2 + $0x7a0] sm:$0xff]  ;;  %v459_v32 = vsub.s32 2, %v2730_v12 }
 0x177   : > { %1835 = vmatpush1.bf16.msra.mxu0 %v1834_v42  ;;  %1963 = vmatpush1.bf16.msra.mxu1 %v1962_v43  ;;  %v841_v42 = vld [vmem:[#allocation2 + $0x690] sm:$0xff] }
 0x178   : > { %1837 = vmatprep.subr.bf16.mxu0 %v1836_v46  ;;  %1965 = vmatprep.subr.bf16.mxu1 %v1964_v47  ;;  %v845_v43 = vld [vmem:[#allocation2 + $0x6b0] sm:$0xff]  ;;  %v850_v46 = vld [vmem:[#allocation2 + $0x6d8] sm:$0xff] }
 0x179   : > { %v854_v47 = vld [vmem:[#allocation2 + $0x6f8] sm:$0xff]  ;;  %v1982_v50 = vpack.c.bf16 %v845_v43, %v841_v42  ;;  %v1870_v42 = vpack.c.bf16 %v875_v31, %v871_v30  ;;  %v1261_v30 = vld [vmem:[#allocation4 + $0x120] sm:$0xff]  ;;  %v1262_v31 = vld [vmem:[#allocation4 + $0x128] sm:$0xff] }
 0x17a   : > { %v1984_v56 = vpack.c.bf16 %v854_v47, %v850_v46  ;;  %v460_v46 = vrot.slane %v2736_v14, %v459_v32  ;;  %v1872_v47 = vpack.c.bf16 %v884_v39, %v880_v38  ;;  %v2046_v39 = vpack.c.bf16 %v1262_v31, %v1261_v30 }
 0x17b   : > { %1839 = vmatpush1.bf16.msra.mxu0 %v1838_v59  ;;  %1967 = vmatpush1.bf16.msra.mxu1 %v1966_v60  ;;  %v853_v59 = vld [vmem:[#allocation2 + $0x6f0] sm:$0xff]  ;;  %v856_v60 = vld [vmem:[#allocation2 + $0x708] sm:$0xff] }
 0x17c   : > { %1841 = vmatprep.subr.bf16.mxu0 %v1840_v0  ;;  %1969 = vmatprep.subr.bf16.mxu1 %v1968_v1  ;;  %v862_v0 = vld [vmem:[#allocation2 + $0x738] sm:$0xff]  ;;  %v1858_v1 = vpack.c.bf16 %v851_v52, %v847_v51  ;;  %v1986_v2 = vpack.c.bf16 %v853_v59, %v849_v57  ;;  %v1860_v5 = vpack.c.bf16 %v860_v61, %v856_v60  ;;  %v885_v51 = vld [vmem:[#allocation2 + $0x7f0] sm:$0xff]  ;;  %v1241_v52 = vld [vmem:[#allocation4 + $0x80] sm:$0xff] }
 0x17d   : > { %v1988_v6 = vpack.c.bf16 %v862_v0, %v858_v62  ;;  %v1274_v57 = vld [vmem:[#allocation4 + $0x188] sm:$0xff]  ;;  %v621_v59 = vadd.f32 %v2756_v58, %v2749_v26  ;;  %v1874_v60 = vpack.c.bf16 %v883_v45, %v879_v44  ;;  %v613_v62 = vadd.f32 %v2751_v36, %v460_v46  ;;  %v1263_v44 = vld [vmem:[#allocation4 + $0x130] sm:$0xff]  ;;  %v1264_v45 = vld [vmem:[#allocation4 + $0x138] sm:$0xff] }
 0x17e   : > { %v619_v58 = vadd.f32 %v2754_v54, %v460_v46  ;;  %v1249_v46 = vld [vmem:[#allocation4 + $0xc0] sm:$0xff] }
 0x17f   : > { %1843 = vmatpush1.bf16.msra.mxu0 %v1842_v8  ;;  %1971 = vmatpush1.bf16.msra.mxu1 %v1970_v9  ;;  %v861_v8 = vld [vmem:[#allocation2 + $0x730] sm:$0xff]  ;;  %v864_v9 = vld [vmem:[#allocation2 + $0x748] sm:$0xff]  ;;  %v625_v26 = vmax.f32 %v613_v62, 0.0 }
 0x180   : > { %1845 = vmatprep.subr.bf16.mxu0 %v1844_v11  ;;  %1973 = vmatprep.subr.bf16.mxu1 %v1972_v16  ;;  %v870_v11 = vld [vmem:[#allocation2 + $0x778] sm:$0xff]  ;;  %v1862_v16 = vpack.c.bf16 %v859_v4, %v855_v3  ;;  %v1990_v17 = vpack.c.bf16 %v861_v8, %v857_v7  ;;  %v1864_v20 = vpack.c.bf16 %v868_v10, %v864_v9  ;;  %v1257_v3 = vld [vmem:[#allocation4 + $0x100] sm:$0xff]  ;;  %v1258_v4 = vld [vmem:[#allocation4 + $0x108] sm:$0xff]  ;;  %v630_v9 = vmax.f32 %v621_v59, 0.0 }
 0x181   : > { %v1992_v21 = vpack.c.bf16 %v870_v11, %v866_v49  ;;  %v1275_v7 = vld [vmem:[#allocation4 + $0x190] sm:$0xff]  ;;  %v1276_v8 = vld [vmem:[#allocation4 + $0x198] sm:$0xff]  ;;  %v2038_v10 = vpack.c.bf16 %v1258_v4, %v1257_v3 }
 0x182   : > { %v1227_v49 = vld [vmem:[#allocation4 + $0x10] sm:$0xff]  ;;  %v1228_v11 = vld [vmem:[#allocation4 + $0x18] sm:$0xff] }
 0x183   : > { %1847 = vmatpush1.bf16.msra.mxu0 %v1846_v22  ;;  %1975 = vmatpush1.bf16.msra.mxu1 %v1974_v23  ;;  %v869_v22 = vld [vmem:[#allocation2 + $0x770] sm:$0xff]  ;;  %v872_v23 = vld [vmem:[#allocation2 + $0x788] sm:$0xff]  ;;  %v2010_v54 = vpack.c.bf16 %v1228_v11, %v1227_v49 }
 0x184   : > { %1849 = vmatprep.subr.bf16.mxu0 %v1848_v27  ;;  %1977 = vmatprep.subr.bf16.mxu1 %v1976_v28  ;;  %v878_v27 = vld [vmem:[#allocation2 + $0x7b8] sm:$0xff]  ;;  %v1866_v28 = vpack.c.bf16 %v867_v19, %v863_v18  ;;  %v1994_v29 = vpack.c.bf16 %v869_v22, %v865_v63  ;;  %v1868_v33 = vpack.c.bf16 %v876_v24, %v872_v23  ;;  %v1259_v18 = vld [vmem:[#allocation4 + $0x110] sm:$0xff]  ;;  %v1277_v63 = vld [vmem:[#allocation4 + $0x1a0] sm:$0xff]  ;;  %v629_v23 = vmax.f32 %v619_v58, 0.0 }
 0x185   : > { %v1996_v34 = vpack.c.bf16 %v878_v27, %v874_v25  ;;  %v1260_v19 = vld [vmem:[#allocation4 + $0x118] sm:$0xff]  ;;  %v1278_v22 = vld [vmem:[#allocation4 + $0x1a8] sm:$0xff]  ;;  %v1229_v25 = vld [vmem:[#allocation4 + $0x20] sm:$0xff] }
 0x186   : > { %v2042_v24 = vpack.c.bf16 %v1260_v19, %v1259_v18  ;;  %v1230_v27 = vld [vmem:[#allocation4 + $0x28] sm:$0xff]  ;;  %v1251_v62 = vld [vmem:[#allocation4 + $0xd0] sm:$0xff]  ;;  %v1237_v18 = vld [vmem:[#allocation4 + $0x60] sm:$0xff] }
 0x187   : > { %1851 = vmatpush1.bf16.msra.mxu0 %v1850_v35  ;;  %1979 = vmatpush1.bf16.msra.mxu1 %v1978_v37  ;;  %v873_v35 = vld [vmem:[#allocation2 + $0x790] sm:$0xff]  ;;  %v2014_v38 = vpack.c.bf16 %v1230_v27, %v1229_v25  ;;  %v1254_v58 = vld [vmem:[#allocation4 + $0xe8] sm:$0xff]  ;;  %v1288_v27 = vld [vmem:[#allocation4 + $0x1f8] sm:$0xff] }
 0x188   : > { %1853 = vmatprep.subr.bf16.mxu0 %v1852_v40  ;;  %1981 = vmatprep.subr.bf16.mxu1 %v1980_v41  ;;  %v877_v37 = vld [vmem:[#allocation2 + $0x7b0] sm:$0xff]  ;;  %v882_v40 = vld [vmem:[#allocation2 + $0x7d8] sm:$0xff]  ;;  %v1238_v19 = vld [vmem:[#allocation4 + $0x68] sm:$0xff] }
 0x189   : > { %v886_v41 = vld [vmem:[#allocation2 + $0x7f8] sm:$0xff]  ;;  %v1998_v43 = vpack.c.bf16 %v877_v37, %v873_v35  ;;  %v1279_v35 = vld [vmem:[#allocation4 + $0x1b0] sm:$0xff] }
 0x18a   : > { %v1280_v37 = vld [vmem:[#allocation4 + $0x1b8] sm:$0xff]  ;;  %v1235_v4 = vld [vmem:[#allocation4 + $0x50] sm:$0xff] }
 0x18b   : > { %1855 = vmatpush1.bf16.msra.mxu0 %v1854_v48  ;;  %1983 = vmatpush1.bf16.msra.mxu1 %v1982_v50  ;;  %v2000_v48 = vpack.c.bf16 %v886_v41, %v882_v40  ;;  %v881_v50 = vld [vmem:[#allocation2 + $0x7d0] sm:$0xff]  ;;  %v1232_v41 = vld [vmem:[#allocation4 + $0x38] sm:$0xff] }
 0x18c   : > { %1857 = vmatprep.subr.bf16.mxu0 %v1856_v55  ;;  %1985 = vmatprep.subr.bf16.mxu1 %v1984_v56  ;;  %v1242_v55 = vld [vmem:[#allocation4 + $0x88] sm:$0xff]  ;;  %v1273_v56 = vld [vmem:[#allocation4 + $0x180] sm:$0xff]  ;;  %v2002_v61 = vpack.c.bf16 %v885_v51, %v881_v50  ;;  %v1231_v40 = vld [vmem:[#allocation4 + $0x30] sm:$0xff] }
 0x18d   : > { %v2004_v14 = vpack.c.bf16 %v1242_v55, %v1241_v52  ;;  %v2036_v0 = vpack.c.bf16 %v1274_v57, %v1273_v56  ;;  %v1282_v50 = vld [vmem:[#allocation4 + $0x1c8] sm:$0xff]  ;;  %v2018_v51 = vpack.c.bf16 %v1232_v41, %v1231_v40  ;;  %v2050_v52 = vpack.c.bf16 %v1264_v45, %v1263_v44  ;;  %v1233_v55 = vld [vmem:[#allocation4 + $0x40] sm:$0xff] }
 0x18e   : > { %v1234_v56 = vld [vmem:[#allocation4 + $0x48] sm:$0xff] }
 0x18f   : > { %1859 = vmatpush1.bf16.msra.mxu0 %v1858_v1  ;;  %1987 = vmatpush1.bf16.msra.mxu1 %v1986_v2  ;;  %v1225_v1 = vld [vmem:[#allocation4] sm:$0xff]  ;;  %v1226_v2 = vld [vmem:[#allocation4 + $0x8] sm:$0xff] }
 0x190   : > { %1861 = vmatprep.subr.bf16.mxu0 %v1860_v5  ;;  %1989 = vmatprep.subr.bf16.mxu1 %v1988_v6  ;;  %v1243_v5 = vld [vmem:[#allocation4 + $0x90] sm:$0xff]  ;;  %v1244_v6 = vld [vmem:[#allocation4 + $0x98] sm:$0xff]  ;;  %v2006_v36 = vpack.c.bf16 %v1226_v2, %v1225_v1  ;;  %v2022_v2 = vpack.c.bf16 %v1234_v56, %v1233_v55 }
 0x191   : > { %v1284_v1 = vld [vmem:[#allocation4 + $0x1d8] sm:$0xff] }
 0x193   : > { %1863 = vmatpush1.bf16.msra.mxu0 %v1862_v16  ;;  %1991 = vmatpush1.bf16.msra.mxu1 %v1990_v17  ;;  %v2008_v16 = vpack.c.bf16 %v1244_v6, %v1243_v5  ;;  %v2040_v17 = vpack.c.bf16 %v1276_v8, %v1275_v7  ;;  %v1236_v5 = vld [vmem:[#allocation4 + $0x58] sm:$0xff]  ;;  %v1267_v8 = vld [vmem:[#allocation4 + $0x150] sm:$0xff] }
 0x194   : > { %1865 = vmatprep.subr.bf16.mxu0 %v1864_v20  ;;  %1993 = vmatprep.subr.bf16.mxu1 %v1992_v21  ;;  %v1245_v20 = vld [vmem:[#allocation4 + $0xa0] sm:$0xff]  ;;  %v1246_v21 = vld [vmem:[#allocation4 + $0xa8] sm:$0xff]  ;;  %v2026_v49 = vpack.c.bf16 %v1236_v5, %v1235_v4 }
 0x197   : > { %1867 = vmatpush1.bf16.msra.mxu0 %v1866_v28  ;;  %1995 = vmatpush1.bf16.msra.mxu1 %v1994_v29  ;;  %v2012_v28 = vpack.c.bf16 %v1246_v21, %v1245_v20  ;;  %v2044_v29 = vpack.c.bf16 %v1278_v22, %v1277_v63  ;;  %v1269_v20 = vld [vmem:[#allocation4 + $0x160] sm:$0xff]  ;;  %v2030_v21 = vpack.c.bf16 %v1238_v19, %v1237_v18  ;;  %v1270_v63 = vld [vmem:[#allocation4 + $0x168] sm:$0xff] }
 0x198   : > { %1869 = vmatprep.subr.bf16.mxu0 %v1868_v33  ;;  %1997 = vmatprep.subr.bf16.mxu1 %v1996_v34  ;;  %v1247_v33 = vld [vmem:[#allocation4 + $0xb0] sm:$0xff]  ;;  %v1248_v34 = vld [vmem:[#allocation4 + $0xb8] sm:$0xff]  ;;  %v2062_v22 = vpack.c.bf16 %v1270_v63, %v1269_v20 }
 0x19b   : > { %1871 = vmatpush1.bf16.msra.mxu0 %v1870_v42  ;;  %1999 = vmatpush1.bf16.msra.mxu1 %v1998_v43  ;;  %v2016_v42 = vpack.c.bf16 %v1248_v34, %v1247_v33  ;;  %v2048_v43 = vpack.c.bf16 %v1280_v37, %v1279_v35  ;;  %v1271_v33 = vld [vmem:[#allocation4 + $0x170] sm:$0xff]  ;;  %v1272_v34 = vld [vmem:[#allocation4 + $0x178] sm:$0xff]  ;;  %v887_v37 = vld [vmem:[%s2791_s4] sm:$0xf] }
 0x19c   : > { %1873 = vmatprep.subr.bf16.mxu0 %v1872_v47  ;;  %2001 = vmatprep.subr.bf16.mxu1 %v2000_v48  ;;  %v1250_v47 = vld [vmem:[#allocation4 + $0xc8] sm:$0xff]  ;;  %v1281_v48 = vld [vmem:[#allocation4 + $0x1c0] sm:$0xff]  ;;  %v2066_v35 = vpack.c.bf16 %v1272_v34, %v1271_v33  ;;  %v896_v40 = vrot.slane %v887_v37, %v455_v15  ;;  %v904_v41 = vrot.slane %v887_v37, %v463_v53 }
 0x19d   : > { %v2020_v57 = vpack.c.bf16 %v1250_v47, %v1249_v46  ;;  %v2052_v59 = vpack.c.bf16 %v1282_v50, %v1281_v48 }
 0x19f   : > { %1875 = vmatpush1.bf16.msra.mxu0 %v1874_v60  ;;  %2003 = vmatpush1.bf16.msra.mxu1 %v2002_v61  ;;  %v1265_v60 = vld [vmem:[#allocation4 + $0x140] sm:$0xff]  ;;  %v1266_v61 = vld [vmem:[#allocation4 + $0x148] sm:$0xff] }
 0x1a0   : > { %2005 = vmatprep.subr.bf16.mxu0 %v2004_v14  ;;  %2037 = vmatprep.subr.bf16.mxu1 %v2036_v0  ;;  %v1252_v14 = vld [vmem:[#allocation4 + $0xd8] sm:$0xff]  ;;  %v1283_v0 = vld [vmem:[#allocation4 + $0x1d0] sm:$0xff]  ;;  %v2054_v3 = vpack.c.bf16 %v1266_v61, %v1265_v60 }
 0x1a1   : > { %v2024_v6 = vpack.c.bf16 %v1252_v14, %v1251_v62  ;;  %v2056_v7 = vpack.c.bf16 %v1284_v1, %v1283_v0 }
 0x1a2   : > { %1051 = vmatmul.mubr.f32.vlgmr.msra.gmra.mrb[4].mxu0 %v625_v26  ;;  %1205 = vmatmul.mubr.f32.vlgmr.msra.gmra.mrb[4].mxu1 %v625_v26  ;;  %v1253_v26 = vld [vmem:[#allocation4 + $0xe0] sm:$0xff] }
 0x1a3   : > { %1056 = vmatprep.mubr.f32.mxu0 %v630_v9  ;;  %1210 = vmatprep.mubr.f32.mxu1 %v630_v9  ;;  %v1268_v9 = vld [vmem:[#allocation4 + $0x158] sm:$0xff] }
 0x1a4   : > { %2007 = vmatpush3.bf16.msra.mxu0 %v2006_v36  ;;  %2039 = vmatpush3.bf16.msra.mxu1 %v2038_v10  ;;  %v1285_v36 = vld [vmem:[#allocation4 + $0x1e0] sm:$0xff]  ;;  %v1286_v10 = vld [vmem:[#allocation4 + $0x1e8] sm:$0xff]  ;;  %v2058_v11 = vpack.c.bf16 %v1268_v9, %v1267_v8 }
 0x1a5   : > { %2009 = vmatprep.subr.bf16.mxu0 %v2008_v16  ;;  %2041 = vmatprep.subr.bf16.mxu1 %v2040_v17  ;;  %v2028_v16 = vpack.c.bf16 %v1254_v58, %v1253_v26  ;;  %v2060_v17 = vpack.c.bf16 %v1286_v10, %v1285_v36 }
 0x1a6   : > { %1057 = vmatmul.mubr.f32.gmra.mrb[6].mxu0 %v629_v23  ;;  %1211 = vmatmul.mubr.f32.gmra.mrb[6].mxu1 %v629_v23  ;;  %v1255_v23 = vld [vmem:[#allocation4 + $0xf0] sm:$0xff] }
 0x1a8   : > { %2011 = vmatpush3.bf16.msra.mxu0 %v2010_v54  ;;  %2043 = vmatpush3.bf16.msra.mxu1 %v2042_v24  ;;  %v1256_v54 = vld [vmem:[#allocation4 + $0xf8] sm:$0xff]  ;;  %v1287_v24 = vld [vmem:[#allocation4 + $0x1f0] sm:$0xff] }
 0x1a9   : > { %2013 = vmatprep.subr.bf16.mxu0 %v2012_v28  ;;  %2045 = vmatprep.subr.bf16.mxu1 %v2044_v29  ;;  %v2032_v25 = vpack.c.bf16 %v1256_v54, %v1255_v23  ;;  %v1239_v28 = vld [vmem:[#allocation4 + $0x70] sm:$0xff]  ;;  %v1240_v29 = vld [vmem:[#allocation4 + $0x78] sm:$0xff]  ;;  %v2064_v30 = vpack.c.bf16 %v1288_v27, %v1287_v24 }
 0x1aa   : > { %v2034_v31 = vpack.c.bf16 %v1240_v29, %v1239_v28 }
 0x1ac   : > { %2015 = vmatpush3.bf16.msra.mxu0 %v2014_v38  ;;  %2047 = vmatpush3.bf16.msra.mxu1 %v2046_v39  ;;  %v892_v38 = vrot.slane %v887_v37, %v451_v13  ;;  %v900_v39 = vrot.slane %v887_v37, %v459_v32 }
 0x1ad   : > { %2017 = vmatprep.subr.bf16.mxu0 %v2016_v42  ;;  %2049 = vmatprep.subr.bf16.mxu1 %v2048_v43 }
 0x1b0   : > { %2019 = vmatpush3.bf16.msra.mxu0 %v2018_v51  ;;  %2051 = vmatpush3.bf16.msra.mxu1 %v2050_v52 }
 0x1b1   : > { %2021 = vmatprep.subr.bf16.mxu0 %v2020_v57  ;;  %2053 = vmatprep.subr.bf16.mxu1 %v2052_v59 }
 0x1b4   : > { %2023 = vmatpush3.bf16.msra.mxu0 %v2022_v2  ;;  %2055 = vmatpush3.bf16.msra.mxu1 %v2054_v3  ;;  %v1540_v3 = vld [vmem:[%s2793_s6] ss:$0 sm:$0xff] }
 0x1b5   : > { %2025 = vmatprep.subr.bf16.mxu0 %v2024_v6  ;;  %2057 = vmatprep.subr.bf16.mxu1 %v2056_v7 }
 0x1b8   : > { %2027 = vmatpush3.bf16.msra.mxu0 %v2026_v49  ;;  %2059 = vmatpush3.bf16.msra.mxu1 %v2058_v11 }
 0x1b9   : > { %2029 = vmatprep.subr.bf16.mxu0 %v2028_v16  ;;  %2061 = vmatprep.subr.bf16.mxu1 %v2060_v17 }
 0x1bc   : > { %2031 = vmatpush3.bf16.msra.mxu0 %v2030_v21  ;;  %2063 = vmatpush3.bf16.msra.mxu1 %v2062_v22 }
 0x1bd   : > { %2033 = vmatprep.subr.bf16.mxu0 %v2032_v25  ;;  %2065 = vmatprep.subr.bf16.mxu1 %v2064_v30 }
 0x1c0   : > { %2035 = vmatpush3.bf16.msra.mxu0 %v2034_v31  ;;  %2067 = vmatpush3.bf16.msra.mxu1 %v2066_v35 }
 0x275   : > { %v1052_v42 = vpop.f32.mrb[4].mxu0  ;;  %v1206_v43 = vpop.f32.mrb[4].mxu1 }
 0x276   : > { %v2068_v44 = vadd.f32 %v1052_v42, %v892_v38  ;;  %v2072_v45 = vadd.f32 %v1206_v43, %v900_v39  ;;  %v1054_v46 = vpop.f32.mrb[5].mxu0  ;;  %v1208_v47 = vpop.f32.mrb[5].mxu1 }
 0x277   : > { %v2069_v48 = vadd.f32 %v1054_v46, %v896_v40  ;;  %v2073_v50 = vadd.f32 %v1208_v47, %v904_v41 }
 0x278   : > { %v1217_v56 = vmax.f32 %v2068_v44, 0.0  ;;  %v1219_v32 = vmax.f32 %v2072_v45, 0.0 }
 0x279   : > { %v1218_v51 = vmax.f32 %v2069_v48, 0.0  ;;  %v1220_v52 = vmax.f32 %v2073_v50, 0.0  ;;  %v1058_v13 = vpop.f32.mrb[6].mxu0  ;;  %v1212_v55 = vpop.f32.mrb[6].mxu1 }
 0x27a   : > { %v2070_v57 = vadd.f32 %v1058_v13, %v892_v38  ;;  %v2074_v59 = vadd.f32 %v1212_v55, %v900_v39  ;;  %v1060_v15 = vpop.f32.mrb[7].mxu0  ;;  %v1214_v60 = vpop.f32.mrb[7].mxu1 }
 0x27b   : > { %v2071_v12 = vadd.f32 %v1060_v15, %v896_v40  ;;  %v2075_v53 = vadd.f32 %v1214_v60, %v904_v41  ;;  %1360 = vmatprep.mubr.f32.mxu0 %v1218_v51  ;;  %1435 = vmatprep.mubr.f32.mxu1 %v1220_v52 }
 0x27c   : > { %1361 = vmatmul.mubr.f32.vlgmr.msra.gmra.mrb[8].mxu0 %v1217_v56  ;;  %1436 = vmatmul.mubr.f32.vlgmr.msra.gmra.mrb[8].mxu1 %v1219_v32  ;;  %v1221_v14 = vmax.f32 %v2070_v57, 0.0  ;;  %v1223_v0 = vmax.f32 %v2074_v59, 0.0 }
 0x27d   : > { %v1222_v61 = vmax.f32 %v2071_v12, 0.0  ;;  %v1224_v62 = vmax.f32 %v2075_v53, 0.0 }
 0x27f   : > { %1365 = vmatprep.mubr.f32.mxu0 %v1222_v61  ;;  %1440 = vmatprep.mubr.f32.mxu1 %v1224_v62 }
 0x280   : > { %1366 = vmatmul.mubr.f32.gmra.mrb[10].mxu0 %v1221_v14  ;;  %1441 = vmatmul.mubr.f32.gmra.mrb[10].mxu1 %v1223_v0 }
 0x34f   : > { %v1576_v1 = vpop.f32.mrb[8].mxu0  ;;  %v1614_v2 = vpop.f32.mrb[8].mxu1 }
 0x350   : > { %v1577_v4 = vpop.f32.mrb[9].mxu0  ;;  %v1615_v5 = vpop.f32.mrb[9].mxu1 }
 0x351   : > { %v1578_v6 = vadd.f32 %v1577_v4, %v1576_v1  ;;  %v1616_v7 = vadd.f32 %v1615_v5, %v1614_v2 }
 0x353   : > { %v1363_v8 = vadd.f32 %v1578_v6, %v1540_v3  ;;  %v1579_v9 = vpop.f32.mrb[10].mxu0  ;;  %v1617_v26 = vpop.f32.mrb[10].mxu1 }
 0x354   : > { %v1580_v58 = vpop.f32.mrb[11].mxu0  ;;  %v1618_v36 = vpop.f32.mrb[11].mxu1 }
 0x355   : > { %v1438_v10 = vadd.f32 %v1616_v7, %v1363_v8  ;;  %v1581_v49 = vadd.f32 %v1580_v58, %v1579_v9  ;;  %v1619_v11 = vadd.f32 %v1618_v36, %v1617_v26 }
 0x357   : > { %1446 = vst [vmem:[%s313_s19] sm:$0xff] %v1438_v10  ;;  %v1368_v16 = vadd.f32 %v1581_v49, %v1540_v3 }
 0x359   : > { %v1443_v17 = vadd.f32 %v1619_v11, %v1368_v16 }
 0x35b   : > { %1447 = vst [vmem:[%s313_s19 + $0x8] sm:$0xff] %v1443_v17 }
 0x35c PF: > { %s19_s24 = sadd.s32 1, %s2187_s24  }
 0x35d   : > { %p16_p2 = scmp.ge.s32.totalorder %s19_s24, 4  }
 0x35f   :  { %18 = sbr.rel (!%p16_p2) target bundleno = 2 (0x2), region = 87 }
 0x366   :  { %1470 = vsyncpa [#allocation3], 1 }
 0x367   :  { %1472 = vsyncpa [#allocation3 + $0x1], 1 }
 0x368   :  { %1473 = vsyncpa [#allocation5], 1 }

</bundles_post_ra>
